<compile_context>
chip_gen: v6e
topology: v6e:2x2x1
jax: 0.10.0
libtpu: 0.0.40
codegen_flags: <defaults>
</compile_context>

<pallas_src>
import functools

import jax
import jax.numpy as jnp
import numpy as np
from jax import lax
from jax.experimental import pallas as pl
from jax.experimental.pallas import tpu as pltpu

LEAKY_VALUE = 0.1


def _round_up(v, m):
    return (v + m - 1) // m * m


def _df_resnet_kernel(x_ref, w1_ref, b1_ref, w2_ref, b2_ref, out_ref,
                      xpad_ref, hpad_ref, col_ref, *,
                      C, C_pad, H, W, K, d1, d2, off1, L1, off2, L2):
    """One batch element: conv1 -> LeakyReLU -> conv2 -> +x, all in VMEM."""
    HW = H * W
    p1 = (K - 1) // 2 * d1
    p2 = (K - 1) // 2 * d2

    # ---- horizontal-wrap masks, hoisted: K distinct masks per conv ------
    wcol = lax.broadcasted_iota(jnp.int32, (1, HW), 1) % W

    def make_masks(p, d):
        masks = []
        for kw in range(K):
            lo, hi = p - kw * d, W + p - kw * d
            if lo > 0 or hi < W:          # static: only edge taps need a mask
                masks.append((wcol >= lo) & (wcol < hi))
            else:
                masks.append(None)
        return masks

    masks1 = make_masks(p1, d1)
    masks2 = make_masks(p2, d2)

    def write_padded(dst_ref, off, L, val_bf16):
        # Zero only the halo margins + padded-channel rows (interior is fully
        # overwritten every step).  Done per step: VMEM scratch is per-core,
        # so a "zero once at program_id==0" guard would break under megacore
        # parallel sharding of the batch axis.
        if off > 0:
            dst_ref[:, 0:off] = jnp.zeros((C_pad, off), jnp.bfloat16)
        tail = L - (off + HW)
        if tail > 0:
            dst_ref[:, off + HW:L] = jnp.zeros((C_pad, tail), jnp.bfloat16)
        if C_pad > C:
            dst_ref[C:C_pad, off:off + HW] = jnp.zeros((C_pad - C, HW),
                                                       jnp.bfloat16)
        dst_ref[0:C, off:off + HW] = val_bf16

    def conv(src_ref, data_off, p, d, w_ref, b_ref, masks):
        # kh-grouped accumulating matmuls: stage a (K*C_pad, HW) bf16 tap
        # group (double-buffered) and contract against the matching
        # (C, K*C_pad) weight slab; MXU for group kh overlaps staging of kh+1.
        acc = None
        for kh in range(K):
            slot = kh & 1
            row_base = data_off + (kh * d - p) * W
            for kw in range(K):
                start = row_base + (kw * d - p)
                piece = src_ref[:, start:start + HW]        # (C_pad, HW) bf16
                if masks[kw] is not None:
                    piece = jnp.where(masks[kw], piece, 0)
                col_ref[slot, kw * C_pad:(kw + 1) * C_pad, :] = piece
            part = jnp.dot(w_ref[kh], col_ref[slot],
                           preferred_element_type=jnp.float32)  # (C, HW) f32
            acc = part if acc is None else acc + part
        return acc + b_ref[...]

    # ---- conv1 (+ bias) + LeakyReLU -------------------------------------
    write_padded(xpad_ref, off1, L1, x_ref[0].astype(jnp.bfloat16))
    h = conv(xpad_ref, off1, p1, d1, w1_ref, b1_ref, masks1)
    h = jnp.where(h >= 0, h, LEAKY_VALUE * h)

    # ---- conv2 (+ bias) + residual (h never leaves VMEM) ----------------
    write_padded(hpad_ref, off2, L2, h.astype(jnp.bfloat16))
    o = conv(hpad_ref, off2, p2, d2, w2_ref, b2_ref, masks2)
    # Re-read x for the residual: collapses the live range instead of
    # holding a (C, HW) f32 value across both convolutions.
    out_ref[0] = (o + x_ref[0].astype(jnp.float32)).astype(out_ref.dtype)


def df_resnet_block(x_nchw, params, dilation, kernel_size):
    """Pallas implementation of df_ResnetBlock.forward. NCHW in / NCHW out."""
    w1, b1, w2, b2 = params                 # torch layout: (O,I,K,K), (O,)
    N, C, H, W = x_nchw.shape
    K = kernel_size
    assert K % 2 == 1, "'same' padding formula assumes odd kernel_size"
    HW = H * W
    d1, d2 = dilation
    p1 = (K - 1) // 2 * d1
    p2 = (K - 1) // 2 * d2
    C_pad = _round_up(C, 16)                # bf16 sublane packing: 16 rows/vreg

    def flat_w(w):
        # (O,I,kh,kw) -> (kh,O,kw,I) -> pad I to C_pad -> (K, C, K*C_pad) bf16
        w_t = jnp.transpose(w, (2, 0, 3, 1))
        w_t = jnp.pad(w_t, ((0, 0), (0, 0), (0, 0), (0, C_pad - C)))
        return w_t.reshape(K, C, K * C_pad).astype(jnp.bfloat16)

    w1f, w2f = flat_w(w1), flat_w(w2)
    b1c = b1.reshape(C, 1).astype(jnp.float32)
    b2c = b2.reshape(C, 1).astype(jnp.float32)

    # Flat-spatial view of contiguous NCHW: free reshape, no transpose.
    x_flat = x_nchw.reshape(N, C, HW)

    def pad_layout(p):
        halo = p * (W + 1)                       # largest |tap offset|
        off = _round_up(halo, 128) if halo else 0
        return off, _round_up(off + HW + halo, 128)

    off1, L1 = pad_layout(p1)
    off2, L2 = pad_layout(p2)

    kernel = functools.partial(
        _df_resnet_kernel, C=C, C_pad=C_pad, H=H, W=W, K=K,
        d1=d1, d2=d2, off1=off1, L1=L1, off2=off2, L2=L2)

    # VMEM budget: double-buffer the gridded in/out blocks only, weights and
    # scratch once, small headroom; clamp to 90% of this chip's VMEM.
    itemsize = jnp.dtype(x_nchw.dtype).itemsize
    io_bytes = 2 * 2 * C * HW * itemsize                    # x block + out block
    w_bytes = 2 * (K * C * K * C_pad * 2 + C * 4)           # bf16 weights + f32 bias
    scratch_bytes = 2 * (C_pad * (L1 + L2) + 2 * K * C_pad * HW)   # all bf16
    need = io_bytes + w_bytes + scratch_bytes
    try:
        cap = int(getattr(pltpu.get_tpu_info(), "vmem_capacity_bytes",
                          64 * 2**20))
    except Exception:  # pragma: no cover - conservative fallback
        cap = 64 * 2**20
    vmem_limit = int(min(0.9 * cap,
                         max(32 * 2**20, int(1.25 * need) + (2 << 20))))

    out_flat = pl.pallas_call(
        kernel,
        out_shape=jax.ShapeDtypeStruct((N, C, HW), x_nchw.dtype),
        grid=(N,),
        in_specs=[
            pl.BlockSpec((1, C, HW), lambda n: (n, 0, 0)),
            pl.BlockSpec((K, C, K * C_pad), lambda n: (0, 0, 0)),
            pl.BlockSpec((C, 1), lambda n: (0, 0)),
            pl.BlockSpec((K, C, K * C_pad), lambda n: (0, 0, 0)),
            pl.BlockSpec((C, 1), lambda n: (0, 0)),
        ],
        out_specs=pl.BlockSpec((1, C, HW), lambda n: (n, 0, 0)),
        scratch_shapes=[
            pltpu.VMEM((C_pad, L1), jnp.bfloat16),           # padded input
            pltpu.VMEM((C_pad, L2), jnp.bfloat16),           # padded activation
            pltpu.VMEM((2, K * C_pad, HW), jnp.bfloat16),    # im2col (2 slots)
        ],
        compiler_params=pltpu.CompilerParams(
            dimension_semantics=("parallel",),
            vmem_limit_bytes=vmem_limit,
        ),
    )(x_flat, w1f, b1c, w2f, b2c)

    return out_flat.reshape(N, C, H, W)


# ---------------------------------------------------------------------------
# Deterministic parameter construction (PyTorch-like uniform init) and a
# plain-JAX reference for verification.
# ---------------------------------------------------------------------------
def make_params(key, C, K):
    """PyTorch-style uniform init; weights kept in torch (O, I, K, K) layout."""
    def one_conv(k):
        k1, k2 = jax.random.split(k)
        bound = 1.0 / np.sqrt(C * K * K)
        w = jax.random.uniform(k1, (C, C, K, K), jnp.float32, -bound, bound)
        b = jax.random.uniform(k2, (C,), jnp.float32, -bound, bound)
        return w, b
    ka, kb = jax.random.split(key)
    w1, b1 = one_conv(ka)
    w2, b2 = one_conv(kb)
    return w1, b1, w2, b2


def reference_block(x, params, dilation, K):
    """Plain-JAX (XLA conv) reference, NCHW end to end."""
    w1, b1, w2, b2 = params

    def conv(inp, w, b, d):
        p = (K - 1) // 2 * d
        y = lax.conv_general_dilated(
            inp, w, window_strides=(1, 1), padding=[(p, p), (p, p)],
            rhs_dilation=(d, d),
            dimension_numbers=("NCHW", "OIHW", "NCHW"))
        return y + b[None, :, None, None]

    h = conv(x, w1, b1, dilation[0])
    h = jnp.where(h >= 0, h, LEAKY_VALUE * h)
    return conv(h, w2, b2, dilation[1]) + x


if __name__ == "__main__":
    N, C, H, W = 2, 4, 16, 16
    K = 3
    dilation = (1, 2)

    key = jax.random.PRNGKey(0)
    kx, kp = jax.random.split(key)
    x = jax.random.normal(kx, (N, C, H, W), jnp.float32)
    params = make_params(kp, C, K)

    out = jax.block_until_ready(df_resnet_block(x, params, dilation, K))
    ref = jax.block_until_ready(reference_block(x, params, dilation, K))

    assert out.shape == (N, C, H, W)
    np.testing.assert_allclose(np.asarray(out), np.asarray(ref),
                               rtol=2e-2, atol=2e-2)
    print("KERNEL_OK")
</pallas_src>

<mosaic_0001>
module attributes {stable_mosaic.version = 11 : i64} {
  func.func @_df_resnet_kernel(%arg0: i32, %arg1: memref<1x4x256xf32, #tpu.memory_space<vmem>>, %arg2: memref<3x4x48xbf16, #tpu.memory_space<vmem>>, %arg3: memref<4x1xf32, #tpu.memory_space<vmem>>, %arg4: memref<3x4x48xbf16, #tpu.memory_space<vmem>>, %arg5: memref<4x1xf32, #tpu.memory_space<vmem>>, %arg6: memref<1x4x256xf32, #tpu.memory_space<vmem>>, %arg7: memref<16x512xbf16, #tpu.memory_space<vmem>>, %arg8: memref<16x512xbf16, #tpu.memory_space<vmem>>, %arg9: memref<2x48x256xbf16, #tpu.memory_space<vmem>>) attributes {dimension_semantics = [#tpu.dimension_semantics<parallel>], iteration_bounds = array<i64: 2>, scalar_prefetch = 0 : i64, scratch_operands = 3 : i64, tpu.core_type = #tpu.core_type<tc>, window_params = [{transform_indices = @transform_0, window_bounds = array<i64: 1, 4, 256>}, {pipeline_mode = #tpu.pipeline_mode<synchronous>, transform_indices = @transform_1, window_bounds = array<i64: 3, 4, 48>}, {pipeline_mode = #tpu.pipeline_mode<synchronous>, transform_indices = @transform_2, window_bounds = array<i64: 4, 1>}, {pipeline_mode = #tpu.pipeline_mode<synchronous>, transform_indices = @transform_3, window_bounds = array<i64: 3, 4, 48>}, {pipeline_mode = #tpu.pipeline_mode<synchronous>, transform_indices = @transform_4, window_bounds = array<i64: 4, 1>}, {transform_indices = @transform_5, window_bounds = array<i64: 1, 4, 256>}]} {
    %0 = tpu.iota {dimensions = array<i32: 1>} : vector<1x256xi32>
    %c16_i32 = arith.constant 16 : i32
    %c0_i32 = arith.constant 0 : i32
    %1 = arith.cmpi eq, %c16_i32, %c0_i32 : i32
    %c1_i32 = arith.constant 1 : i32
    %2 = arith.select %1, %c1_i32, %c16_i32 : i32
    %3 = vector.broadcast %2 : i32 to vector<1x256xi32>
    %4 = arith.remsi %0, %3 : vector<1x256xi32>
    %c0_i32_0 = arith.constant 0 : i32
    %5 = vector.broadcast %c0_i32_0 : i32 to vector<1x256xi32>
    %6 = arith.cmpi ne, %4, %5 : vector<1x256xi32>
    %c0_i32_1 = arith.constant 0 : i32
    %7 = vector.broadcast %c0_i32_1 : i32 to vector<1x256xi32>
    %8 = arith.cmpi slt, %4, %7 : vector<1x256xi32>
    %c0_i32_2 = arith.constant 0 : i32
    %9 = arith.cmpi slt, %2, %c0_i32_2 : i32
    %10 = vector.broadcast %9 : i1 to vector<1x256xi1>
    %11 = vector.broadcast %10 : vector<1x256xi1> to vector<1x256xi1>
    %12 = arith.xori %8, %11 : vector<1x256xi1>
    %13 = arith.andi %12, %6 : vector<1x256xi1>
    %14 = vector.broadcast %2 : i32 to vector<1x256xi32>
    %15 = arith.addi %4, %14 : vector<1x256xi32>
    %16 = arith.select %13, %15, %4 : vector<1x256xi1>, vector<1x256xi32>
    %c1_i32_3 = arith.constant 1 : i32
    %17 = vector.broadcast %c1_i32_3 : i32 to vector<1x256xi32>
    %18 = arith.cmpi sge, %16, %17 : vector<1x256xi32>
    %c17_i32 = arith.constant 17 : i32
    %19 = vector.broadcast %c17_i32 : i32 to vector<1x256xi32>
    %20 = arith.cmpi slt, %16, %19 : vector<1x256xi32>
    %21 = arith.andi %18, %20 : vector<1x256xi1>
    %c-1_i32 = arith.constant -1 : i32
    %22 = vector.broadcast %c-1_i32 : i32 to vector<1x256xi32>
    %23 = arith.cmpi sge, %16, %22 : vector<1x256xi32>
    %c15_i32 = arith.constant 15 : i32
    %24 = vector.broadcast %c15_i32 : i32 to vector<1x256xi32>
    %25 = arith.cmpi slt, %16, %24 : vector<1x256xi32>
    %26 = arith.andi %23, %25 : vector<1x256xi1>
    %c2_i32 = arith.constant 2 : i32
    %27 = vector.broadcast %c2_i32 : i32 to vector<1x256xi32>
    %28 = arith.cmpi sge, %16, %27 : vector<1x256xi32>
    %c18_i32 = arith.constant 18 : i32
    %29 = vector.broadcast %c18_i32 : i32 to vector<1x256xi32>
    %30 = arith.cmpi slt, %16, %29 : vector<1x256xi32>
    %31 = arith.andi %28, %30 : vector<1x256xi1>
    %c-2_i32 = arith.constant -2 : i32
    %32 = vector.broadcast %c-2_i32 : i32 to vector<1x256xi32>
    %33 = arith.cmpi sge, %16, %32 : vector<1x256xi32>
    %c14_i32 = arith.constant 14 : i32
    %34 = vector.broadcast %c14_i32 : i32 to vector<1x256xi32>
    %35 = arith.cmpi slt, %16, %34 : vector<1x256xi32>
    %36 = arith.andi %33, %35 : vector<1x256xi1>
    %c0 = arith.constant 0 : index
    %c0_4 = arith.constant 0 : index
    %c0_5 = arith.constant 0 : index
    %37 = vector.load %arg1[%c0, %c0_4, %c0_5] : memref<1x4x256xf32, #tpu.memory_space<vmem>>, vector<1x4x256xf32>
    %38 = vector.shape_cast %37 : vector<1x4x256xf32> to vector<4x256xf32>
    %39 = arith.truncf %38 : vector<4x256xf32> to vector<4x256xbf16>
    %cst = arith.constant 0.000000e+00 : bf16
    %40 = vector.broadcast %cst : bf16 to vector<16x128xbf16>
    %c0_6 = arith.constant 0 : index
    %c0_7 = arith.constant 0 : index
    %41 = vector.load %arg7[%c0_6, %c0_7] : memref<16x512xbf16, #tpu.memory_space<vmem>>, vector<16x128xbf16>
    tpu.vector_store %arg7[%c0_6, %c0_7], %40 {strides = array<i32>} : memref<16x512xbf16, #tpu.memory_space<vmem>>, vector<16x128xbf16>,
    %cst_8 = arith.constant 0.000000e+00 : bf16
    %42 = vector.broadcast %cst_8 : bf16 to vector<16x128xbf16>
    %c0_9 = arith.constant 0 : index
    %c384 = arith.constant 384 : index
    %43 = vector.load %arg7[%c0_9, %c384] : memref<16x512xbf16, #tpu.memory_space<vmem>>, vector<16x128xbf16>
    tpu.vector_store %arg7[%c0_9, %c384], %42 {strides = array<i32>} : memref<16x512xbf16, #tpu.memory_space<vmem>>, vector<16x128xbf16>,
    %cst_10 = arith.constant 0.000000e+00 : bf16
    %44 = vector.broadcast %cst_10 : bf16 to vector<12x256xbf16>
    %c4 = arith.constant 4 : index
    %c128 = arith.constant 128 : index
    %45 = vector.load %arg7[%c4, %c128] : memref<16x512xbf16, #tpu.memory_space<vmem>>, vector<12x256xbf16>
    tpu.vector_store %arg7[%c4, %c128], %44 {strides = array<i32>} : memref<16x512xbf16, #tpu.memory_space<vmem>>, vector<12x256xbf16>,
    %c0_11 = arith.constant 0 : index
    %c128_12 = arith.constant 128 : index
    %46 = vector.load %arg7[%c0_11, %c128_12] : memref<16x512xbf16, #tpu.memory_space<vmem>>, vector<4x256xbf16>
    tpu.vector_store %arg7[%c0_11, %c128_12], %39 {strides = array<i32>} : memref<16x512xbf16, #tpu.memory_space<vmem>>, vector<4x256xbf16>,
    %c0_13 = arith.constant 0 : index
    %c111 = arith.constant 111 : index
    %47 = vector.load %arg7[%c0_13, %c111] : memref<16x512xbf16, #tpu.memory_space<vmem>>, vector<16x256xbf16>
    %c0_i32_14 = arith.constant 0 : i32
    %48 = arith.sitofp %c0_i32_14 : i32 to bf16
    %49 = vector.shape_cast %21 : vector<1x256xi1> to vector<1x256xi1>
    %50 = vector.broadcast %49 : vector<1x256xi1> to vector<16x256xi1>
    %51 = vector.broadcast %48 : bf16 to vector<16x256xbf16>
    %52 = arith.select %50, %47, %51 : vector<16x256xi1>, vector<16x256xbf16>
    %c0_15 = arith.constant 0 : index
    %c0_16 = arith.constant 0 : index
    %c0_17 = arith.constant 0 : index
    %53 = vector.load %arg9[%c0_15, %c0_16, %c0_17] : memref<2x48x256xbf16, #tpu.memory_space<vmem>>, vector<1x16x256xbf16>
    %54 = vector.shape_cast %53 : vector<1x16x256xbf16> to vector<16x256xbf16>
    %55 = vector.shape_cast %52 : vector<16x256xbf16> to vector<1x16x256xbf16>
    tpu.vector_store %arg9[%c0_15, %c0_16, %c0_17], %55 {strides = array<i32>} : memref<2x48x256xbf16, #tpu.memory_space<vmem>>, vector<1x16x256xbf16>,
    %c0_18 = arith.constant 0 : index
    %c112 = arith.constant 112 : index
    %56 = vector.load %arg7[%c0_18, %c112] : memref<16x512xbf16, #tpu.memory_space<vmem>>, vector<16x256xbf16>
    %c0_19 = arith.constant 0 : index
    %c16 = arith.constant 16 : index
    %c0_20 = arith.constant 0 : index
    %57 = vector.load %arg9[%c0_19, %c16, %c0_20] : memref<2x48x256xbf16, #tpu.memory_space<vmem>>, vector<1x16x256xbf16>
    %58 = vector.shape_cast %57 : vector<1x16x256xbf16> to vector<16x256xbf16>
    %59 = vector.shape_cast %56 : vector<16x256xbf16> to vector<1x16x256xbf16>
    tpu.vector_store %arg9[%c0_19, %c16, %c0_20], %59 {strides = array<i32>} : memref<2x48x256xbf16, #tpu.memory_space<vmem>>, vector<1x16x256xbf16>,
    %c0_21 = arith.constant 0 : index
    %c113 = arith.constant 113 : index
    %60 = vector.load %arg7[%c0_21, %c113] : memref<16x512xbf16, #tpu.memory_space<vmem>>, vector<16x256xbf16>
    %c0_i32_22 = arith.constant 0 : i32
    %61 = arith.sitofp %c0_i32_22 : i32 to bf16
    %62 = vector.shape_cast %26 : vector<1x256xi1> to vector<1x256xi1>
    %63 = vector.broadcast %62 : vector<1x256xi1> to vector<16x256xi1>
    %64 = vector.broadcast %61 : bf16 to vector<16x256xbf16>
    %65 = arith.select %63, %60, %64 : vector<16x256xi1>, vector<16x256xbf16>
    %c0_23 = arith.constant 0 : index
    %c32 = arith.constant 32 : index
    %c0_24 = arith.constant 0 : index
    %66 = vector.load %arg9[%c0_23, %c32, %c0_24] : memref<2x48x256xbf16, #tpu.memory_space<vmem>>, vector<1x16x256xbf16>
    %67 = vector.shape_cast %66 : vector<1x16x256xbf16> to vector<16x256xbf16>
    %68 = vector.shape_cast %65 : vector<16x256xbf16> to vector<1x16x256xbf16>
    tpu.vector_store %arg9[%c0_23, %c32, %c0_24], %68 {strides = array<i32>} : memref<2x48x256xbf16, #tpu.memory_space<vmem>>, vector<1x16x256xbf16>,
    %c0_25 = arith.constant 0 : index
    %c0_26 = arith.constant 0 : index
    %c0_27 = arith.constant 0 : index
    %69 = vector.load %arg2[%c0_25, %c0_26, %c0_27] : memref<3x4x48xbf16, #tpu.memory_space<vmem>>, vector<1x4x48xbf16>
    %70 = vector.shape_cast %69 : vector<1x4x48xbf16> to vector<4x48xbf16>
    %c0_28 = arith.constant 0 : index
    %c0_29 = arith.constant 0 : index
    %c0_30 = arith.constant 0 : index
    %71 = vector.load %arg9[%c0_28, %c0_29, %c0_30] : memref<2x48x256xbf16, #tpu.memory_space<vmem>>, vector<1x48x256xbf16>
    %72 = vector.shape_cast %71 : vector<1x48x256xbf16> to vector<48x256xbf16>
    %cst_31 = arith.constant dense<0.000000e+00> : vector<4x256xf32>
    %73 = tpu.matmul %70, %72, %cst_31 {dimension_numbers = #tpu.dot_dimension_numbers<[1], [0], [0], [1], [0, 0, 1, 1], [], []>} : vector<4x48xbf16>, vector<48x256xbf16>, vector<4x256xf32> -> vector<4x256xf32>
    %c0_32 = arith.constant 0 : index
    %c127 = arith.constant 127 : index
    %74 = vector.load %arg7[%c0_32, %c127] : memref<16x512xbf16, #tpu.memory_space<vmem>>, vector<16x256xbf16>
    %c0_i32_33 = arith.constant 0 : i32
    %75 = arith.sitofp %c0_i32_33 : i32 to bf16
    %76 = vector.shape_cast %21 : vector<1x256xi1> to vector<1x256xi1>
    %77 = vector.broadcast %76 : vector<1x256xi1> to vector<16x256xi1>
    %78 = vector.broadcast %75 : bf16 to vector<16x256xbf16>
    %79 = arith.select %77, %74, %78 : vector<16x256xi1>, vector<16x256xbf16>
    %c1 = arith.constant 1 : index
    %c0_34 = arith.constant 0 : index
    %c0_35 = arith.constant 0 : index
    %80 = vector.load %arg9[%c1, %c0_34, %c0_35] : memref<2x48x256xbf16, #tpu.memory_space<vmem>>, vector<1x16x256xbf16>
    %81 = vector.shape_cast %80 : vector<1x16x256xbf16> to vector<16x256xbf16>
    %82 = vector.shape_cast %79 : vector<16x256xbf16> to vector<1x16x256xbf16>
    tpu.vector_store %arg9[%c1, %c0_34, %c0_35], %82 {strides = array<i32>} : memref<2x48x256xbf16, #tpu.memory_space<vmem>>, vector<1x16x256xbf16>,
    %c0_36 = arith.constant 0 : index
    %c128_37 = arith.constant 128 : index
    %83 = vector.load %arg7[%c0_36, %c128_37] : memref<16x512xbf16, #tpu.memory_space<vmem>>, vector<16x256xbf16>
    %c1_38 = arith.constant 1 : index
    %c16_39 = arith.constant 16 : index
    %c0_40 = arith.constant 0 : index
    %84 = vector.load %arg9[%c1_38, %c16_39, %c0_40] : memref<2x48x256xbf16, #tpu.memory_space<vmem>>, vector<1x16x256xbf16>
    %85 = vector.shape_cast %84 : vector<1x16x256xbf16> to vector<16x256xbf16>
    %86 = vector.shape_cast %83 : vector<16x256xbf16> to vector<1x16x256xbf16>
    tpu.vector_store %arg9[%c1_38, %c16_39, %c0_40], %86 {strides = array<i32>} : memref<2x48x256xbf16, #tpu.memory_space<vmem>>, vector<1x16x256xbf16>,
    %c0_41 = arith.constant 0 : index
    %c129 = arith.constant 129 : index
    %87 = vector.load %arg7[%c0_41, %c129] : memref<16x512xbf16, #tpu.memory_space<vmem>>, vector<16x256xbf16>
    %c0_i32_42 = arith.constant 0 : i32
    %88 = arith.sitofp %c0_i32_42 : i32 to bf16
    %89 = vector.shape_cast %26 : vector<1x256xi1> to vector<1x256xi1>
    %90 = vector.broadcast %89 : vector<1x256xi1> to vector<16x256xi1>
    %91 = vector.broadcast %88 : bf16 to vector<16x256xbf16>
    %92 = arith.select %90, %87, %91 : vector<16x256xi1>, vector<16x256xbf16>
    %c1_43 = arith.constant 1 : index
    %c32_44 = arith.constant 32 : index
    %c0_45 = arith.constant 0 : index
    %93 = vector.load %arg9[%c1_43, %c32_44, %c0_45] : memref<2x48x256xbf16, #tpu.memory_space<vmem>>, vector<1x16x256xbf16>
    %94 = vector.shape_cast %93 : vector<1x16x256xbf16> to vector<16x256xbf16>
    %95 = vector.shape_cast %92 : vector<16x256xbf16> to vector<1x16x256xbf16>
    tpu.vector_store %arg9[%c1_43, %c32_44, %c0_45], %95 {strides = array<i32>} : memref<2x48x256xbf16, #tpu.memory_space<vmem>>, vector<1x16x256xbf16>,
    %c1_46 = arith.constant 1 : index
    %c0_47 = arith.constant 0 : index
    %c0_48 = arith.constant 0 : index
    %96 = vector.load %arg2[%c1_46, %c0_47, %c0_48] : memref<3x4x48xbf16, #tpu.memory_space<vmem>>, vector<1x4x48xbf16>
    %97 = vector.shape_cast %96 : vector<1x4x48xbf16> to vector<4x48xbf16>
    %c1_49 = arith.constant 1 : index
    %c0_50 = arith.constant 0 : index
    %c0_51 = arith.constant 0 : index
    %98 = vector.load %arg9[%c1_49, %c0_50, %c0_51] : memref<2x48x256xbf16, #tpu.memory_space<vmem>>, vector<1x48x256xbf16>
    %99 = vector.shape_cast %98 : vector<1x48x256xbf16> to vector<48x256xbf16>
    %cst_52 = arith.constant dense<0.000000e+00> : vector<4x256xf32>
    %100 = tpu.matmul %97, %99, %cst_52 {dimension_numbers = #tpu.dot_dimension_numbers<[1], [0], [0], [1], [0, 0, 1, 1], [], []>} : vector<4x48xbf16>, vector<48x256xbf16>, vector<4x256xf32> -> vector<4x256xf32>
    %101 = arith.addf %73, %100 : vector<4x256xf32>
    %c0_53 = arith.constant 0 : index
    %c143 = arith.constant 143 : index
    %102 = vector.load %arg7[%c0_53, %c143] : memref<16x512xbf16, #tpu.memory_space<vmem>>, vector<16x256xbf16>
    %c0_i32_54 = arith.constant 0 : i32
    %103 = arith.sitofp %c0_i32_54 : i32 to bf16
    %104 = vector.shape_cast %21 : vector<1x256xi1> to vector<1x256xi1>
    %105 = vector.broadcast %104 : vector<1x256xi1> to vector<16x256xi1>
    %106 = vector.broadcast %103 : bf16 to vector<16x256xbf16>
    %107 = arith.select %105, %102, %106 : vector<16x256xi1>, vector<16x256xbf16>
    %c0_55 = arith.constant 0 : index
    %c0_56 = arith.constant 0 : index
    %c0_57 = arith.constant 0 : index
    %108 = vector.load %arg9[%c0_55, %c0_56, %c0_57] : memref<2x48x256xbf16, #tpu.memory_space<vmem>>, vector<1x16x256xbf16>
    %109 = vector.shape_cast %108 : vector<1x16x256xbf16> to vector<16x256xbf16>
    %110 = vector.shape_cast %107 : vector<16x256xbf16> to vector<1x16x256xbf16>
    tpu.vector_store %arg9[%c0_55, %c0_56, %c0_57], %110 {strides = array<i32>} : memref<2x48x256xbf16, #tpu.memory_space<vmem>>, vector<1x16x256xbf16>,
    %c0_58 = arith.constant 0 : index
    %c144 = arith.constant 144 : index
    %111 = vector.load %arg7[%c0_58, %c144] : memref<16x512xbf16, #tpu.memory_space<vmem>>, vector<16x256xbf16>
    %c0_59 = arith.constant 0 : index
    %c16_60 = arith.constant 16 : index
    %c0_61 = arith.constant 0 : index
    %112 = vector.load %arg9[%c0_59, %c16_60, %c0_61] : memref<2x48x256xbf16, #tpu.memory_space<vmem>>, vector<1x16x256xbf16>
    %113 = vector.shape_cast %112 : vector<1x16x256xbf16> to vector<16x256xbf16>
    %114 = vector.shape_cast %111 : vector<16x256xbf16> to vector<1x16x256xbf16>
    tpu.vector_store %arg9[%c0_59, %c16_60, %c0_61], %114 {strides = array<i32>} : memref<2x48x256xbf16, #tpu.memory_space<vmem>>, vector<1x16x256xbf16>,
    %c0_62 = arith.constant 0 : index
    %c145 = arith.constant 145 : index
    %115 = vector.load %arg7[%c0_62, %c145] : memref<16x512xbf16, #tpu.memory_space<vmem>>, vector<16x256xbf16>
    %c0_i32_63 = arith.constant 0 : i32
    %116 = arith.sitofp %c0_i32_63 : i32 to bf16
    %117 = vector.shape_cast %26 : vector<1x256xi1> to vector<1x256xi1>
    %118 = vector.broadcast %117 : vector<1x256xi1> to vector<16x256xi1>
    %119 = vector.broadcast %116 : bf16 to vector<16x256xbf16>
    %120 = arith.select %118, %115, %119 : vector<16x256xi1>, vector<16x256xbf16>
    %c0_64 = arith.constant 0 : index
    %c32_65 = arith.constant 32 : index
    %c0_66 = arith.constant 0 : index
    %121 = vector.load %arg9[%c0_64, %c32_65, %c0_66] : memref<2x48x256xbf16, #tpu.memory_space<vmem>>, vector<1x16x256xbf16>
    %122 = vector.shape_cast %121 : vector<1x16x256xbf16> to vector<16x256xbf16>
    %123 = vector.shape_cast %120 : vector<16x256xbf16> to vector<1x16x256xbf16>
    tpu.vector_store %arg9[%c0_64, %c32_65, %c0_66], %123 {strides = array<i32>} : memref<2x48x256xbf16, #tpu.memory_space<vmem>>, vector<1x16x256xbf16>,
    %c2 = arith.constant 2 : index
    %c0_67 = arith.constant 0 : index
    %c0_68 = arith.constant 0 : index
    %124 = vector.load %arg2[%c2, %c0_67, %c0_68] : memref<3x4x48xbf16, #tpu.memory_space<vmem>>, vector<1x4x48xbf16>
    %125 = vector.shape_cast %124 : vector<1x4x48xbf16> to vector<4x48xbf16>
    %c0_69 = arith.constant 0 : index
    %c0_70 = arith.constant 0 : index
    %c0_71 = arith.constant 0 : index
    %126 = vector.load %arg9[%c0_69, %c0_70, %c0_71] : memref<2x48x256xbf16, #tpu.memory_space<vmem>>, vector<1x48x256xbf16>
    %127 = vector.shape_cast %126 : vector<1x48x256xbf16> to vector<48x256xbf16>
    %cst_72 = arith.constant dense<0.000000e+00> : vector<4x256xf32>
    %128 = tpu.matmul %125, %127, %cst_72 {dimension_numbers = #tpu.dot_dimension_numbers<[1], [0], [0], [1], [0, 0, 1, 1], [], []>} : vector<4x48xbf16>, vector<48x256xbf16>, vector<4x256xf32> -> vector<4x256xf32>
    %129 = arith.addf %101, %128 : vector<4x256xf32>
    %c0_73 = arith.constant 0 : index
    %c0_74 = arith.constant 0 : index
    %130 = vector.load %arg3[%c0_73, %c0_74] : memref<4x1xf32, #tpu.memory_space<vmem>>, vector<4x1xf32>
    %131 = vector.broadcast %130 : vector<4x1xf32> to vector<4x256xf32>
    %132 = arith.addf %129, %131 : vector<4x256xf32>
    %cst_75 = arith.constant 0.000000e+00 : f32
    %133 = vector.broadcast %cst_75 : f32 to vector<4x256xf32>
    %134 = arith.cmpf oge, %132, %133 : vector<4x256xf32>
    %cst_76 = arith.constant 1.000000e-01 : f32
    %135 = vector.broadcast %cst_76 : f32 to vector<4x256xf32>
    %136 = arith.mulf %135, %132 : vector<4x256xf32>
    %137 = arith.select %134, %132, %136 : vector<4x256xi1>, vector<4x256xf32>
    %138 = arith.truncf %137 : vector<4x256xf32> to vector<4x256xbf16>
    %cst_77 = arith.constant 0.000000e+00 : bf16
    %139 = vector.broadcast %cst_77 : bf16 to vector<16x128xbf16>
    %c0_78 = arith.constant 0 : index
    %c0_79 = arith.constant 0 : index
    %140 = vector.load %arg8[%c0_78, %c0_79] : memref<16x512xbf16, #tpu.memory_space<vmem>>, vector<16x128xbf16>
    tpu.vector_store %arg8[%c0_78, %c0_79], %139 {strides = array<i32>} : memref<16x512xbf16, #tpu.memory_space<vmem>>, vector<16x128xbf16>,
    %cst_80 = arith.constant 0.000000e+00 : bf16
    %141 = vector.broadcast %cst_80 : bf16 to vector<16x128xbf16>
    %c0_81 = arith.constant 0 : index
    %c384_82 = arith.constant 384 : index
    %142 = vector.load %arg8[%c0_81, %c384_82] : memref<16x512xbf16, #tpu.memory_space<vmem>>, vector<16x128xbf16>
    tpu.vector_store %arg8[%c0_81, %c384_82], %141 {strides = array<i32>} : memref<16x512xbf16, #tpu.memory_space<vmem>>, vector<16x128xbf16>,
    %cst_83 = arith.constant 0.000000e+00 : bf16
    %143 = vector.broadcast %cst_83 : bf16 to vector<12x256xbf16>
    %c4_84 = arith.constant 4 : index
    %c128_85 = arith.constant 128 : index
    %144 = vector.load %arg8[%c4_84, %c128_85] : memref<16x512xbf16, #tpu.memory_space<vmem>>, vector<12x256xbf16>
    tpu.vector_store %arg8[%c4_84, %c128_85], %143 {strides = array<i32>} : memref<16x512xbf16, #tpu.memory_space<vmem>>, vector<12x256xbf16>,
    %c0_86 = arith.constant 0 : index
    %c128_87 = arith.constant 128 : index
    %145 = vector.load %arg8[%c0_86, %c128_87] : memref<16x512xbf16, #tpu.memory_space<vmem>>, vector<4x256xbf16>
    tpu.vector_store %arg8[%c0_86, %c128_87], %138 {strides = array<i32>} : memref<16x512xbf16, #tpu.memory_space<vmem>>, vector<4x256xbf16>,
    %c0_88 = arith.constant 0 : index
    %c94 = arith.constant 94 : index
    %146 = vector.load %arg8[%c0_88, %c94] : memref<16x512xbf16, #tpu.memory_space<vmem>>, vector<16x256xbf16>
    %c0_i32_89 = arith.constant 0 : i32
    %147 = arith.sitofp %c0_i32_89 : i32 to bf16
    %148 = vector.shape_cast %31 : vector<1x256xi1> to vector<1x256xi1>
    %149 = vector.broadcast %148 : vector<1x256xi1> to vector<16x256xi1>
    %150 = vector.broadcast %147 : bf16 to vector<16x256xbf16>
    %151 = arith.select %149, %146, %150 : vector<16x256xi1>, vector<16x256xbf16>
    %c0_90 = arith.constant 0 : index
    %c0_91 = arith.constant 0 : index
    %c0_92 = arith.constant 0 : index
    %152 = vector.load %arg9[%c0_90, %c0_91, %c0_92] : memref<2x48x256xbf16, #tpu.memory_space<vmem>>, vector<1x16x256xbf16>
    %153 = vector.shape_cast %152 : vector<1x16x256xbf16> to vector<16x256xbf16>
    %154 = vector.shape_cast %151 : vector<16x256xbf16> to vector<1x16x256xbf16>
    tpu.vector_store %arg9[%c0_90, %c0_91, %c0_92], %154 {strides = array<i32>} : memref<2x48x256xbf16, #tpu.memory_space<vmem>>, vector<1x16x256xbf16>,
    %c0_93 = arith.constant 0 : index
    %c96 = arith.constant 96 : index
    %155 = vector.load %arg8[%c0_93, %c96] : memref<16x512xbf16, #tpu.memory_space<vmem>>, vector<16x256xbf16>
    %c0_94 = arith.constant 0 : index
    %c16_95 = arith.constant 16 : index
    %c0_96 = arith.constant 0 : index
    %156 = vector.load %arg9[%c0_94, %c16_95, %c0_96] : memref<2x48x256xbf16, #tpu.memory_space<vmem>>, vector<1x16x256xbf16>
    %157 = vector.shape_cast %156 : vector<1x16x256xbf16> to vector<16x256xbf16>
    %158 = vector.shape_cast %155 : vector<16x256xbf16> to vector<1x16x256xbf16>
    tpu.vector_store %arg9[%c0_94, %c16_95, %c0_96], %158 {strides = array<i32>} : memref<2x48x256xbf16, #tpu.memory_space<vmem>>, vector<1x16x256xbf16>,
    %c0_97 = arith.constant 0 : index
    %c98 = arith.constant 98 : index
    %159 = vector.load %arg8[%c0_97, %c98] : memref<16x512xbf16, #tpu.memory_space<vmem>>, vector<16x256xbf16>
    %c0_i32_98 = arith.constant 0 : i32
    %160 = arith.sitofp %c0_i32_98 : i32 to bf16
    %161 = vector.shape_cast %36 : vector<1x256xi1> to vector<1x256xi1>
    %162 = vector.broadcast %161 : vector<1x256xi1> to vector<16x256xi1>
    %163 = vector.broadcast %160 : bf16 to vector<16x256xbf16>
    %164 = arith.select %162, %159, %163 : vector<16x256xi1>, vector<16x256xbf16>
    %c0_99 = arith.constant 0 : index
    %c32_100 = arith.constant 32 : index
    %c0_101 = arith.constant 0 : index
    %165 = vector.load %arg9[%c0_99, %c32_100, %c0_101] : memref<2x48x256xbf16, #tpu.memory_space<vmem>>, vector<1x16x256xbf16>
    %166 = vector.shape_cast %165 : vector<1x16x256xbf16> to vector<16x256xbf16>
    %167 = vector.shape_cast %164 : vector<16x256xbf16> to vector<1x16x256xbf16>
    tpu.vector_store %arg9[%c0_99, %c32_100, %c0_101], %167 {strides = array<i32>} : memref<2x48x256xbf16, #tpu.memory_space<vmem>>, vector<1x16x256xbf16>,
    %c0_102 = arith.constant 0 : index
    %c0_103 = arith.constant 0 : index
    %c0_104 = arith.constant 0 : index
    %168 = vector.load %arg4[%c0_102, %c0_103, %c0_104] : memref<3x4x48xbf16, #tpu.memory_space<vmem>>, vector<1x4x48xbf16>
    %169 = vector.shape_cast %168 : vector<1x4x48xbf16> to vector<4x48xbf16>
    %c0_105 = arith.constant 0 : index
    %c0_106 = arith.constant 0 : index
    %c0_107 = arith.constant 0 : index
    %170 = vector.load %arg9[%c0_105, %c0_106, %c0_107] : memref<2x48x256xbf16, #tpu.memory_space<vmem>>, vector<1x48x256xbf16>
    %171 = vector.shape_cast %170 : vector<1x48x256xbf16> to vector<48x256xbf16>
    %cst_108 = arith.constant dense<0.000000e+00> : vector<4x256xf32>
    %172 = tpu.matmul %169, %171, %cst_108 {dimension_numbers = #tpu.dot_dimension_numbers<[1], [0], [0], [1], [0, 0, 1, 1], [], []>} : vector<4x48xbf16>, vector<48x256xbf16>, vector<4x256xf32> -> vector<4x256xf32>
    %c0_109 = arith.constant 0 : index
    %c126 = arith.constant 126 : index
    %173 = vector.load %arg8[%c0_109, %c126] : memref<16x512xbf16, #tpu.memory_space<vmem>>, vector<16x256xbf16>
    %c0_i32_110 = arith.constant 0 : i32
    %174 = arith.sitofp %c0_i32_110 : i32 to bf16
    %175 = vector.shape_cast %31 : vector<1x256xi1> to vector<1x256xi1>
    %176 = vector.broadcast %175 : vector<1x256xi1> to vector<16x256xi1>
    %177 = vector.broadcast %174 : bf16 to vector<16x256xbf16>
    %178 = arith.select %176, %173, %177 : vector<16x256xi1>, vector<16x256xbf16>
    %c1_111 = arith.constant 1 : index
    %c0_112 = arith.constant 0 : index
    %c0_113 = arith.constant 0 : index
    %179 = vector.load %arg9[%c1_111, %c0_112, %c0_113] : memref<2x48x256xbf16, #tpu.memory_space<vmem>>, vector<1x16x256xbf16>
    %180 = vector.shape_cast %179 : vector<1x16x256xbf16> to vector<16x256xbf16>
    %181 = vector.shape_cast %178 : vector<16x256xbf16> to vector<1x16x256xbf16>
    tpu.vector_store %arg9[%c1_111, %c0_112, %c0_113], %181 {strides = array<i32>} : memref<2x48x256xbf16, #tpu.memory_space<vmem>>, vector<1x16x256xbf16>,
    %c0_114 = arith.constant 0 : index
    %c128_115 = arith.constant 128 : index
    %182 = vector.load %arg8[%c0_114, %c128_115] : memref<16x512xbf16, #tpu.memory_space<vmem>>, vector<16x256xbf16>
    %c1_116 = arith.constant 1 : index
    %c16_117 = arith.constant 16 : index
    %c0_118 = arith.constant 0 : index
    %183 = vector.load %arg9[%c1_116, %c16_117, %c0_118] : memref<2x48x256xbf16, #tpu.memory_space<vmem>>, vector<1x16x256xbf16>
    %184 = vector.shape_cast %183 : vector<1x16x256xbf16> to vector<16x256xbf16>
    %185 = vector.shape_cast %182 : vector<16x256xbf16> to vector<1x16x256xbf16>
    tpu.vector_store %arg9[%c1_116, %c16_117, %c0_118], %185 {strides = array<i32>} : memref<2x48x256xbf16, #tpu.memory_space<vmem>>, vector<1x16x256xbf16>,
    %c0_119 = arith.constant 0 : index
    %c130 = arith.constant 130 : index
    %186 = vector.load %arg8[%c0_119, %c130] : memref<16x512xbf16, #tpu.memory_space<vmem>>, vector<16x256xbf16>
    %c0_i32_120 = arith.constant 0 : i32
    %187 = arith.sitofp %c0_i32_120 : i32 to bf16
    %188 = vector.shape_cast %36 : vector<1x256xi1> to vector<1x256xi1>
    %189 = vector.broadcast %188 : vector<1x256xi1> to vector<16x256xi1>
    %190 = vector.broadcast %187 : bf16 to vector<16x256xbf16>
    %191 = arith.select %189, %186, %190 : vector<16x256xi1>, vector<16x256xbf16>
    %c1_121 = arith.constant 1 : index
    %c32_122 = arith.constant 32 : index
    %c0_123 = arith.constant 0 : index
    %192 = vector.load %arg9[%c1_121, %c32_122, %c0_123] : memref<2x48x256xbf16, #tpu.memory_space<vmem>>, vector<1x16x256xbf16>
    %193 = vector.shape_cast %192 : vector<1x16x256xbf16> to vector<16x256xbf16>
    %194 = vector.shape_cast %191 : vector<16x256xbf16> to vector<1x16x256xbf16>
    tpu.vector_store %arg9[%c1_121, %c32_122, %c0_123], %194 {strides = array<i32>} : memref<2x48x256xbf16, #tpu.memory_space<vmem>>, vector<1x16x256xbf16>,
    %c1_124 = arith.constant 1 : index
    %c0_125 = arith.constant 0 : index
    %c0_126 = arith.constant 0 : index
    %195 = vector.load %arg4[%c1_124, %c0_125, %c0_126] : memref<3x4x48xbf16, #tpu.memory_space<vmem>>, vector<1x4x48xbf16>
    %196 = vector.shape_cast %195 : vector<1x4x48xbf16> to vector<4x48xbf16>
    %c1_127 = arith.constant 1 : index
    %c0_128 = arith.constant 0 : index
    %c0_129 = arith.constant 0 : index
    %197 = vector.load %arg9[%c1_127, %c0_128, %c0_129] : memref<2x48x256xbf16, #tpu.memory_space<vmem>>, vector<1x48x256xbf16>
    %198 = vector.shape_cast %197 : vector<1x48x256xbf16> to vector<48x256xbf16>
    %cst_130 = arith.constant dense<0.000000e+00> : vector<4x256xf32>
    %199 = tpu.matmul %196, %198, %cst_130 {dimension_numbers = #tpu.dot_dimension_numbers<[1], [0], [0], [1], [0, 0, 1, 1], [], []>} : vector<4x48xbf16>, vector<48x256xbf16>, vector<4x256xf32> -> vector<4x256xf32>
    %200 = arith.addf %172, %199 : vector<4x256xf32>
    %c0_131 = arith.constant 0 : index
    %c158 = arith.constant 158 : index
    %201 = vector.load %arg8[%c0_131, %c158] : memref<16x512xbf16, #tpu.memory_space<vmem>>, vector<16x256xbf16>
    %c0_i32_132 = arith.constant 0 : i32
    %202 = arith.sitofp %c0_i32_132 : i32 to bf16
    %203 = vector.shape_cast %31 : vector<1x256xi1> to vector<1x256xi1>
    %204 = vector.broadcast %203 : vector<1x256xi1> to vector<16x256xi1>
    %205 = vector.broadcast %202 : bf16 to vector<16x256xbf16>
    %206 = arith.select %204, %201, %205 : vector<16x256xi1>, vector<16x256xbf16>
    %c0_133 = arith.constant 0 : index
    %c0_134 = arith.constant 0 : index
    %c0_135 = arith.constant 0 : index
    %207 = vector.load %arg9[%c0_133, %c0_134, %c0_135] : memref<2x48x256xbf16, #tpu.memory_space<vmem>>, vector<1x16x256xbf16>
    %208 = vector.shape_cast %207 : vector<1x16x256xbf16> to vector<16x256xbf16>
    %209 = vector.shape_cast %206 : vector<16x256xbf16> to vector<1x16x256xbf16>
    tpu.vector_store %arg9[%c0_133, %c0_134, %c0_135], %209 {strides = array<i32>} : memref<2x48x256xbf16, #tpu.memory_space<vmem>>, vector<1x16x256xbf16>,
    %c0_136 = arith.constant 0 : index
    %c160 = arith.constant 160 : index
    %210 = vector.load %arg8[%c0_136, %c160] : memref<16x512xbf16, #tpu.memory_space<vmem>>, vector<16x256xbf16>
    %c0_137 = arith.constant 0 : index
    %c16_138 = arith.constant 16 : index
    %c0_139 = arith.constant 0 : index
    %211 = vector.load %arg9[%c0_137, %c16_138, %c0_139] : memref<2x48x256xbf16, #tpu.memory_space<vmem>>, vector<1x16x256xbf16>
    %212 = vector.shape_cast %211 : vector<1x16x256xbf16> to vector<16x256xbf16>
    %213 = vector.shape_cast %210 : vector<16x256xbf16> to vector<1x16x256xbf16>
    tpu.vector_store %arg9[%c0_137, %c16_138, %c0_139], %213 {strides = array<i32>} : memref<2x48x256xbf16, #tpu.memory_space<vmem>>, vector<1x16x256xbf16>,
    %c0_140 = arith.constant 0 : index
    %c162 = arith.constant 162 : index
    %214 = vector.load %arg8[%c0_140, %c162] : memref<16x512xbf16, #tpu.memory_space<vmem>>, vector<16x256xbf16>
    %c0_i32_141 = arith.constant 0 : i32
    %215 = arith.sitofp %c0_i32_141 : i32 to bf16
    %216 = vector.shape_cast %36 : vector<1x256xi1> to vector<1x256xi1>
    %217 = vector.broadcast %216 : vector<1x256xi1> to vector<16x256xi1>
    %218 = vector.broadcast %215 : bf16 to vector<16x256xbf16>
    %219 = arith.select %217, %214, %218 : vector<16x256xi1>, vector<16x256xbf16>
    %c0_142 = arith.constant 0 : index
    %c32_143 = arith.constant 32 : index
    %c0_144 = arith.constant 0 : index
    %220 = vector.load %arg9[%c0_142, %c32_143, %c0_144] : memref<2x48x256xbf16, #tpu.memory_space<vmem>>, vector<1x16x256xbf16>
    %221 = vector.shape_cast %220 : vector<1x16x256xbf16> to vector<16x256xbf16>
    %222 = vector.shape_cast %219 : vector<16x256xbf16> to vector<1x16x256xbf16>
    tpu.vector_store %arg9[%c0_142, %c32_143, %c0_144], %222 {strides = array<i32>} : memref<2x48x256xbf16, #tpu.memory_space<vmem>>, vector<1x16x256xbf16>,
    %c2_145 = arith.constant 2 : index
    %c0_146 = arith.constant 0 : index
    %c0_147 = arith.constant 0 : index
    %223 = vector.load %arg4[%c2_145, %c0_146, %c0_147] : memref<3x4x48xbf16, #tpu.memory_space<vmem>>, vector<1x4x48xbf16>
    %224 = vector.shape_cast %223 : vector<1x4x48xbf16> to vector<4x48xbf16>
    %c0_148 = arith.constant 0 : index
    %c0_149 = arith.constant 0 : index
    %c0_150 = arith.constant 0 : index
    %225 = vector.load %arg9[%c0_148, %c0_149, %c0_150] : memref<2x48x256xbf16, #tpu.memory_space<vmem>>, vector<1x48x256xbf16>
    %226 = vector.shape_cast %225 : vector<1x48x256xbf16> to vector<48x256xbf16>
    %cst_151 = arith.constant dense<0.000000e+00> : vector<4x256xf32>
    %227 = tpu.matmul %224, %226, %cst_151 {dimension_numbers = #tpu.dot_dimension_numbers<[1], [0], [0], [1], [0, 0, 1, 1], [], []>} : vector<4x48xbf16>, vector<48x256xbf16>, vector<4x256xf32> -> vector<4x256xf32>
    %228 = arith.addf %200, %227 : vector<4x256xf32>
    %c0_152 = arith.constant 0 : index
    %c0_153 = arith.constant 0 : index
    %229 = vector.load %arg5[%c0_152, %c0_153] : memref<4x1xf32, #tpu.memory_space<vmem>>, vector<4x1xf32>
    %230 = vector.broadcast %229 : vector<4x1xf32> to vector<4x256xf32>
    %231 = arith.addf %228, %230 : vector<4x256xf32>
    %c0_154 = arith.constant 0 : index
    %c0_155 = arith.constant 0 : index
    %c0_156 = arith.constant 0 : index
    %232 = vector.load %arg1[%c0_154, %c0_155, %c0_156] : memref<1x4x256xf32, #tpu.memory_space<vmem>>, vector<1x4x256xf32>
    %233 = vector.shape_cast %232 : vector<1x4x256xf32> to vector<4x256xf32>
    %234 = arith.addf %231, %233 : vector<4x256xf32>
    %c0_157 = arith.constant 0 : index
    %c0_158 = arith.constant 0 : index
    %c0_159 = arith.constant 0 : index
    %235 = vector.load %arg6[%c0_157, %c0_158, %c0_159] : memref<1x4x256xf32, #tpu.memory_space<vmem>>, vector<1x4x256xf32>
    %236 = vector.shape_cast %235 : vector<1x4x256xf32> to vector<4x256xf32>
    %237 = vector.shape_cast %234 : vector<4x256xf32> to vector<1x4x256xf32>
    tpu.vector_store %arg6[%c0_157, %c0_158, %c0_159], %237 {strides = array<i32>} : memref<1x4x256xf32, #tpu.memory_space<vmem>>, vector<1x4x256xf32>,
    return
  }
  func.func @transform_0(%arg0: i32) -> (i32, i32, i32) {
    %c0_i32 = arith.constant 0 : i32
    %c0_i32_0 = arith.constant 0 : i32
    %c0_i32_1 = arith.constant 0 : i32
    return %arg0, %c0_i32, %c0_i32_0 : i32, i32, i32
  }
  func.func @transform_1(%arg0: i32) -> (i32, i32, i32) {
    %c0_i32 = arith.constant 0 : i32
    %c0_i32_0 = arith.constant 0 : i32
    %c0_i32_1 = arith.constant 0 : i32
    %c0_i32_2 = arith.constant 0 : i32
    return %c0_i32, %c0_i32_0, %c0_i32_1 : i32, i32, i32
  }
  func.func @transform_2(%arg0: i32) -> (i32, i32) {
    %c0_i32 = arith.constant 0 : i32
    %c0_i32_0 = arith.constant 0 : i32
    %c0_i32_1 = arith.constant 0 : i32
    return %c0_i32, %c0_i32_0 : i32, i32
  }
  func.func @transform_3(%arg0: i32) -> (i32, i32, i32) {
    %c0_i32 = arith.constant 0 : i32
    %c0_i32_0 = arith.constant 0 : i32
    %c0_i32_1 = arith.constant 0 : i32
    %c0_i32_2 = arith.constant 0 : i32
    return %c0_i32, %c0_i32_0, %c0_i32_1 : i32, i32, i32
  }
  func.func @transform_4(%arg0: i32) -> (i32, i32) {
    %c0_i32 = arith.constant 0 : i32
    %c0_i32_0 = arith.constant 0 : i32
    %c0_i32_1 = arith.constant 0 : i32
    return %c0_i32, %c0_i32_0 : i32, i32
  }
  func.func @transform_5(%arg0: i32) -> (i32, i32, i32) {
    %c0_i32 = arith.constant 0 : i32
    %c0_i32_0 = arith.constant 0 : i32
    %c0_i32_1 = arith.constant 0 : i32
    return %arg0, %c0_i32, %c0_i32_0 : i32, i32, i32
  }
}

</mosaic_0001>

<bundles_post_ra>
// kernel: tpu_custom_call.1
= control target key start
LH: loop header
LB: loop body
LE: loop exit
PB: predicated region body
PF: predicated region fallthrough
CT: control target
= control target key end

     0   :  { %10 = vsyncpa [#allocation6], 0  ;;  %s2403_s0 = inlined_call_operand.hbm [shape: f32[2,4,256], index: 0, kind: input, shape index: {}]   ;;  %s2404_s1 = inlined_call_operand.vmem [shape: bf16[3,4,48], index: 1, kind: input, shape index: {}]   ;;  %s2405_s2 = inlined_call_operand.vmem [shape: f32[4,1], index: 2, kind: input, shape index: {}]   ;;  %s2406_s3 = inlined_call_operand.vmem [shape: bf16[3,4,48], index: 3, kind: input, shape index: {}]   ;;  %s2407_s4 = inlined_call_operand.vmem [shape: f32[4,1], index: 4, kind: input, shape index: {}]   ;;  %s2408_s5 = inlined_call_operand.hbm [shape: f32[2,4,256], index: 5, kind: output, shape index: {}]  }
   0x1   :  { %12 = vsyncpa [#allocation6 + $0x1], 0 }
   0x2   :  { %13 = vsyncpa [#allocation7], 0 }
   0x3   :  { %15 = vsyncpa [#allocation7 + $0x1], 0  ;;  %s1836_s18 = smov 0   ;;  %s1838_s19 = smov 0  }
   0x4   :  { %s1840_s20 = smov 0   ;;  %s1842_s21 = smov 0  }
   0x5 LB: > { %s1857_s22 = sadd.s32 4294967295, %s1785_s21   ;;  %s1560_s23 = sadd.s32 4294967294, %s1785_s21   ;;  %s1785_s21 = sphi %s1842_s21, %s2446_s21   ;;  %s1781_s20 = sphi %s1840_s20, %s2445_s20   ;;  %s1777_s19 = sphi %s1838_s19, %s2444_s19   ;;  %s1773_s18 = sphi %s1836_s18, %s2443_s18  }
   0x6   : > { %s1861_s24 = sadd.s32 1, %s1785_s21   ;;  %s28_s25 = sadd.s32 1, %s1781_s20 }
   0x7   : > { %s25_s26 = ssub.s32 %s1785_s21, %s1861_s24  ;;  %p35_p0 = scmp.ne.s32.totalorder %s1781_s20, %s1777_s19 }
   0x8   : > { %p26_p1 = scmp.eq.s32.totalorder %s25_s26, 0  ;;  %p36_p2 = scmp.eq.s32.totalorder %s1785_s21, 0 }
   0x9   : > { %p41_p3 = scmp.ne.s32.totalorder %s1777_s19, %s1773_s18  ;;  %p42_p4 = scmp.eq.s32.totalorder %s1857_s22, 0 }
   0xa   : > { %s1873_s27 = scalar_select %p26_p1, %s1781_s20, %s28_s25  }
   0xb   : > { %p1875_p5 = por %p36_p2, %p35_p0  ;;  %p1879_p6 = por %p42_p4, %p41_p3 }
   0xc   : > { %p149_p7 = scmp.eq.s32.totalorder %s1857_s22, 1  ;;  %p155_p8 = scmp.eq.s32.totalorder %s1560_s23, 1 }
   0xd   : > { %s2413_s29 = scalar_select %p1879_p6, 1, 0 }
   0xe   : > { %p1638_p10 = scmp.lt.s32.totalorder %s1785_s21, 2  ;;  %p1886_p11 = por %p149_p7, %p35_p0 }
   0xf   : > { %p1890_p12 = por %p155_p8, %p41_p3  ;;  %s187_s7 = sand.u32 1, %s1781_s20  }
  0x10   : > { %s2414_s30 = scalar_select %p1886_p11, 1, 0 }
  0x11   : > { %s2415_s6 = scalar_select %p1890_p12, 1, 0 }
  0x12   : > { %s1622_s8 = sshll.u32 %s1785_s21, 7  ;;  %s1563_s9 = sshll.u32 %s187_s7, 3 }
  0x13   : > { %s1899_s12 = scalar_lea.hbm %s2403_s0, %s1622_s8  ;;  %s191_s13 = scalar_lea.vmem [#allocation5], %s1563_s9 }
  0x14   : > { %s199_s14 = sshll.u32 %s191_s13, 4  ;;  %p1903_p13 = pnand %p1638_p10, %p1875_p5  ;;  %s1907_s14 = int_to_ptr.vmem [resolvable:$true] %s199_s14 }
  0x15   : > { %s188_s16 = scalar_lea.sflag [#allocation6], %s187_s7  ;;  %s1693_s17 = scalar_lea.hbm %s1899_s12, 128 }
  0x16   : > { %p1694_p2 = scmp.ne.s32.totalorder %s1899_s12, %s1693_s17  ;;  %p1695_p3 = pneg %p1903_p13 }
  0x17   : > { %s1698_s26 = scalar_lea.hbm %s2403_s0, 256  ;;  %p1699_p5 = scmp.lt.s32.totalorder %s1899_s12, %s2403_s0 }
  0x18   : > { %p1696_p4 = pnand %p1695_p3, %p1694_p2  ;;  %p1700_p8 = scmp.lt.s32.totalorder %s1698_s26, %s1693_s17 }
  0x1a   : > { %p1697_p7 = pneg %p1696_p4  ;;  %p1701_p10 = por %p1700_p8, %p1699_p5 }
  0x1c   : > { %p1702_p9 = pnand %p1701_p10, %p1697_p7 }
  0x1e   : > { %1705 = shalt.err (!%p1702_p9)
}
  0x1f   : > { %s1706_s7 = scalar_lea.vmem %s1907_s14, 128  ;;  %s1787_s9 = smov [#allocation5]  }
  0x20   : > { %p1707_p0 = scmp.ne.s32.totalorder %s1907_s14, %s1706_s7  ;;  %s1711_s10 = sshll.u32 %s1787_s9, 4  ;;  %s1712_s10 = int_to_ptr.vmem [resolvable:$false] %s1711_s10 }
  0x21   : > { %s1713_s11 = scalar_lea.vmem %s1712_s10, 256  ;;  %p1714_p4 = scmp.lt.s32.totalorder %s1907_s14, %s1712_s10 }
  0x22   : > { %p1709_p1 = pnand %p1707_p0, %p1695_p3  ;;  %p1715_p12 = scmp.lt.s32.totalorder %s1713_s11, %s1706_s7 }
  0x24   : > { %p1710_p2 = pneg %p1709_p1  ;;  %p1716_p11 = por %p1715_p12, %p1714_p4 }
  0x26   : > { %p1717_p6 = pnand %p1716_p11, %p1710_p2 }
  0x28   : > { %1720 = shalt.err (!%p1717_p6)
}
  0x29   : > { %1633 = dma.hbm_to_vmem [thread:$0]  (!%p1903_p13), %s1899_s12, 128, %s1907_s14, %s188_s16  }
  0x2a   : > { %p2417_p9 = scmp.lt.s32.totalorder %s1785_s21, 3  ;;  %p2418_p7 = scmp.ge.s32.totalorder %s1785_s21, 1 }
  0x2c   : > { %p205_p0 = pnand %p2418_p7, %p2417_p9 }
  0x2d   : > { %s1934_s13 = sand.u32 (!%p205_p0), 1, %s1777_s19   ;;  %p2419_p6 = scmp.ne.s32.totalorder (!%p205_p0), %s2413_s29, 0 }
  0x2e   : > { %208 = sbr.rel (%p205_p0) target bundleno = 936 (0x3a8), region = 40  ;;  %s1567_s17 = sshll.u32 (!%p205_p0), %s1934_s13, 3 }
  0x2f   : > { %s211_s23 = scalar_lea.sflag (!%p205_p0), [#allocation6], %s1934_s13  ;;  %s1940_s15 = scalar_lea.vmem (!%p205_p0), [#allocation5], %s1567_s17 }
  0x33   : > { %v244_v0 = vlaneseq }
  0x34   : > { %1764 = dma.done.wait (%p2419_p6), %s211_s23, 128  }
  0x35   : > { %1766 = vsyncadd (%p2419_p6), %s211_s23, 4294967168  ;;  %v1788_v1 = vmov 0   ;;  %v245_v2 = vand.u32 127, %v244_v0  ;;  %v295_v6 = vld [vmem:[%s1940_s15] sm:$0xff]  ;;  %s1789_s29 = smov 1   ;;  %s1790_s12 = smov 113  }
  0x36   : > { %301 = vst [vmem:[#allocation2] sm:$0xf] %v1788_v1  ;;  %302 = vst [vmem:[#allocation2 + $0x10] sm:$0xf] %v1788_v1  ;;  %600 = vmatprep.mubr.bf16.mxu0 %v1788_v1  ;;  %674 = vmatprep.mubr.bf16.mxu1 %v1788_v1  ;;  %v297_v7 = vcombine.high %v295_v6, %v295_v6  ;;  %s1791_s14 = smov 127   ;;  %s1792_s16 = smov 17  }
  0x37   : > { %303 = vst [vmem:[#allocation2 + $0xc] sm:$0xf] %v1788_v1  ;;  %304 = vst [vmem:[#allocation2 + $0x1c] sm:$0xf] %v1788_v1  ;;  %1689 = vset.pattern.permute.xlu0 %v1788_v1  ;;  %v246_v3 = vadd.s32 128, %v245_v2  ;;  %v1961_v4 = vand.u32 15, %v245_v2 }
  0x38   : > { %305 = vst [vmem:[#allocation2 + $0x4] sm:$0xcc] %v1788_v1  ;;  %306 = vst [vmem:[#allocation2 + $0x14] sm:$0xff] %v1788_v1  ;;  %v1623_v9 = vpack.c.bf16 %v297_v7, %v295_v6  ;;  %s1793_s25 = smov 111   ;;  %s1794_s26 = smov 15   ;;  %vm475_vm6 = vcmask 7168  }
  0x39   : > { %888 = vst [vmem:[#allocation3] sm:$0xf] %v1788_v1  ;;  %889 = vst [vmem:[#allocation3 + $0x10] sm:$0xf] %v1788_v1  ;;  %v1963_v5 = vand.u32 15, %v246_v3  ;;  %vm279_vm0 = vcmp.lt.s32.totalorder %v1961_v4, 15 }
  0x3a   : > { %890 = vst [vmem:[#allocation3 + $0xc] sm:$0xf] %v1788_v1  ;;  %891 = vst [vmem:[#allocation3 + $0x1c] sm:$0xf] %v1788_v1  ;;  %vm271_vm1 = vcmp.ge.s32.totalorder %v1961_v4, 1  ;;  %s1795_s28 = smov 16  }
  0x3b   : > { %892 = vst [vmem:[#allocation3 + $0x4] sm:$0xcc] %v1788_v1  ;;  %893 = vst [vmem:[#allocation3 + $0x14] sm:$0xff] %v1788_v1  ;;  %vm280_vm2 = vcmp.lt.s32.totalorder %v1963_v5, 15  ;;  %vm272_vm3 = vcmp.ge.s32.totalorder %v1963_v5, 1  ;;  %s1796_s8 = smov 112  }
  0x3c   : > { %vm398_vm4 = vmpackc.low %vm280_vm2, %vm279_vm0  ;;  %313 = vst [vmem:[#allocation2 + $0x4] sm:$0x33] %v1623_v9  ;;  %vm450_vm9 = vcmask 1039360   ;;  %vm403_vm12 = vcmask 924672   ;;  %vm353_vm15 = vcmask 138240   ;;  %vm327_vm2 = vcmask 908288  }
  0x3d   : > { %v399_v8 = vsel %vm398_vm4, 65537, %v1788_v1  ;;  %vm322_vm5 = vmpackc.low %vm272_vm3, %vm271_vm1  ;;  %s1797_s10 = smov 2   ;;  %s1798_s11 = smov 126  }
  0x3e   : > { %492 = vrot.lane.b32.xlu0 %v399_v8, %s1789_s29  ;;  %400 = vrot.lane.b32.xlu1 %v399_v8, %s1790_s12  ;;  %v323_v10 = vsel %vm322_vm5, 65537, %v1788_v1  ;;  %v722_v13 = vld [vmem:[#allocation2 + $0xc] sm:$0xf]  ;;  %v724_v17 = vld [vmem:[#allocation2 + $0x1c] sm:$0xf]  ;;  %vm428_vm5 = vcmask 121856  }
  0x3f   : > { %v364_v11 = vld [vmem:[#allocation2 + $0x18] sm:$0xf]  ;;  %v1978_v12 = vld [vmem:[#allocation2 + $0x10] sm:$0xff]  ;;  %v489_v20 = vld [vmem:[#allocation2 + $0xc] sm:$0xf]  ;;  %s1799_s23 = smov 98  }
  0x40   : > { %v491_v26 = vld [vmem:[#allocation2 + $0x1c] sm:$0xf]  ;;  %v446_v35 = vld [vmem:[#allocation2 + $0x18] sm:$0xf]  ;;  %v751_v47 = vld [vmem:[#allocation2 + $0xc] sm:$0xf] }
  0x41   : > { %v393_v45 = vld [vmem:[#allocation2 + $0x18] sm:$0xf]  ;;  %v753_v55 = vld [vmem:[#allocation2 + $0x1c] sm:$0xf]  ;;  %v684_v3 = vld [vmem:[#allocation2 + $0xc] sm:$0xf] }
  0x42   : > { %447 = vrot.lane.b32.xlu0 %v323_v10, %s1791_s14  ;;  %754 = vrot.lane.b32.xlu1 %v399_v8, %s1792_s16  ;;  %v317_v0 = vld [vmem:[#allocation2 + $0x18] sm:$0xf]  ;;  %p2440_p12 = scmp.ne.s32.totalorder %s2414_s30, 0 }
  0x43   : > { %v1981_v14 = vld [vmem:[#allocation2] sm:$0xff]  ;;  %v362_v15 = vld [vmem:[#allocation2 + $0x8] sm:$0xf] }
  0x44   : > { %v1984_v16 = vld [vmem:[#allocation2 + $0x4] sm:$0xff] }
  0x45   : > { %v444_v28 = vld [vmem:[#allocation2 + $0x8] sm:$0xf]  ;;  %v1574_v38 = vcombine.high %v1984_v16, %v1788_v1 }
  0x46   : > { %324 = vrot.lane.b32.xlu0 %v323_v10, %s1793_s25  ;;  %687 = vrot.lane.b32.xlu1 %v323_v10, %s1794_s26  ;;  %v391_v37 = vld [vmem:[#allocation2 + $0x8] sm:$0xf] }
  0x47   : > { %v315_v57 = vld [vmem:[#allocation2 + $0x8] sm:$0xf] }
  0x4a   : > { %375 = vrot.lane.b32.xlu1 %v364_v11, %s1795_s28  ;;  %373 = vrot.lane.b32.xlu0 %v1978_v12, %s1795_s28  ;;  %v686_v11 = vld [vmem:[#allocation2 + $0x1c] sm:$0xf] }
  0x4e   : > { %731 = vrot.lane.b32.xlu1 %v722_v13, %s1796_s8  ;;  %369 = vrot.lane.b32.xlu0 %v1981_v14, %s1795_s28 }
  0x52   : > { %371 = vrot.lane.b32.xlu1 %v362_v15, %s1795_s28  ;;  %729 = vrot.lane.b32.xlu0 %v1984_v16, %s1796_s8  ;;  %s1625_s28 = sshll.u32 %s1857_s22, 7 }
  0x56   : > { %735 = vrot.lane.b32.xlu1 %v724_v17, %s1796_s8  ;;  %733 = vrot.lane.b32.xlu0 %v1788_v1, %s1796_s8  ;;  %s240_s8 = scalar_lea.vmem [#allocation8], %s1567_s17 }
  0x57   : > { %s1490_s7 = sshll.u32 %s240_s8, 4  ;;  %s1491_s7 = int_to_ptr.vmem [resolvable:$true] %s1490_s7 }
  0xb0   : > { %v493_v18 = vpop.permute.xlu0 %492  ;;  %v401_v31 = vpop.permute.xlu1 %400 }
  0xb1   : > { %v494_v19 = vrot.slane %v493_v18, 4  ;;  %v402_v33 = vrot.slane %v401_v31, 4 }
  0xb3   : > { %v495_v21 = vsel %vm475_vm6, %v494_v19, %v493_v18  ;;  %vm497_vm7 = vcmp.ne.s16.totalorder %v494_v19, 0  ;;  %v404_v36 = vsel %vm403_vm12, %v402_v33, %v401_v31  ;;  %vm2006_vm13 = vcmp.ne.s16.totalorder %v402_v33, 0 }
  0xb4   : > { %vm496_vm8 = vcmp.ne.s16.totalorder %v495_v21, 0  ;;  %v499_v22 = vsel %vm497_vm7, %v489_v20, 0  ;;  %v448_v23 = vpop.permute.xlu0 %447  ;;  %v501_v30 = vsel %vm497_vm7, %v491_v26, 0  ;;  %v755_v40 = vpop.permute.xlu1 %754  ;;  %vm405_vm14 = vcmp.ne.s16.totalorder %v404_v36, 0 }
  0xb5   : > { %508 = vrot.lane.b32.xlu1 %v499_v22, %s1791_s14  ;;  %v449_v24 = vrot.slane %v448_v23, 4  ;;  %v498_v25 = vsel %vm496_vm8, %v1984_v16, 0  ;;  %v408_v42 = vsel %vm2006_vm13, %v391_v37, 0  ;;  %v756_v43 = vrot.slane %v755_v40, 4 }
  0xb6   : > { %506 = vrot.lane.b32.xlu0 %v498_v25, %s1791_s14  ;;  %v407_v44 = vsel %vm405_vm14, %v1981_v14, 0  ;;  %v410_v49 = vsel %vm2006_vm13, %v393_v45, 0  ;;  %v409_v51 = vsel %vm405_vm14, %v1978_v12, 0  ;;  %vm283_vm14 = vcmp.ge.s32.totalorder %v1961_v4, 2 }
  0xb7   : > { %v451_v27 = vsel %vm450_vm9, %v449_v24, %v448_v23  ;;  %vm1993_vm10 = vcmp.ne.s16.totalorder %v449_v24, 0  ;;  %v757_v46 = vsel %vm353_vm15, %v756_v43, %v755_v40  ;;  %vm2021_vm0 = vcmp.ne.s16.totalorder %v756_v43, 0 }
  0xb8   : > { %vm452_vm11 = vcmp.ne.s16.totalorder %v451_v27, 0  ;;  %v455_v32 = vsel %vm1993_vm10, %v444_v28, 0  ;;  %v457_v39 = vsel %vm1993_vm10, %v446_v35, 0  ;;  %v325_v50 = vpop.permute.xlu0 %324  ;;  %vm758_vm1 = vcmp.ne.s16.totalorder %v757_v46, 0  ;;  %v688_v60 = vpop.permute.xlu1 %687 }
  0xb9   : > { %512 = vrot.lane.b32.xlu1 %v501_v30, %s1791_s14  ;;  %v454_v34 = vsel %vm452_vm11, %v1981_v14, 0  ;;  %v456_v41 = vsel %vm452_vm11, %v1978_v12, 0  ;;  %v761_v52 = vsel %vm2021_vm0, %v751_v47, 0  ;;  %v326_v53 = vrot.slane %v325_v50, 4 }
  0xba   : > { %510 = vrot.lane.b32.xlu0 %v1788_v1, %s1791_s14  ;;  %v760_v54 = vsel %vm758_vm1, %v1984_v16, 0  ;;  %v763_v59 = vsel %vm2021_vm0, %v753_v55, 0  ;;  %v689_v62 = vrot.slane %v688_v60, 4  ;;  %vm291_vm10 = vcmp.lt.s32.totalorder %v1961_v4, 14  ;;  %s1802_s14 = smov 30  }
  0xbb   : > { %v328_v56 = vsel %vm327_vm2, %v326_v53, %v325_v50  ;;  %vm2036_vm3 = vcmp.ne.s16.totalorder %v326_v53, 0  ;;  %vm292_vm11 = vcmp.lt.s32.totalorder %v1963_v5, 14  ;;  %vm284_vm0 = vcmp.ge.s32.totalorder %v1963_v5, 2  ;;  %v2084_v5 = vld [vmem:[#allocation3 + $0x10] sm:$0xff] }
  0xbc   : > { %vm329_vm4 = vcmp.ne.s16.totalorder %v328_v56, 0  ;;  %v332_v61 = vsel %vm2036_vm3, %v315_v57, 0  ;;  %v690_v2 = vsel %vm428_vm5, %v689_v62, %v688_v60  ;;  %vm2051_vm7 = vcmp.ne.s16.totalorder %v689_v62, 0  ;;  %vm984_vm13 = vmpackc.low %vm292_vm11, %vm291_vm10  ;;  %v2089_v15 = vpop.permute.xlu0 %373  ;;  %v376_v17 = vpop.permute.xlu1 %375 }
  0xbd   : > { %464 = vrot.lane.b32.xlu1 %v455_v32, %s1789_s29  ;;  %v331_v63 = vsel %vm329_vm4, %v1981_v14, 0  ;;  %v334_v7 = vsel %vm2036_vm3, %v317_v0, 0  ;;  %v333_v8 = vsel %vm329_vm4, %v1978_v12, 0  ;;  %vm691_vm8 = vcmp.ne.s16.totalorder %v690_v2, 0  ;;  %v872_v14 = vld [vmem:[%s2405_s2] sm:$0xf]  ;;  %vm909_vm1 = vmpackc.low %vm284_vm0, %vm283_vm14 }
  0xbe   : > { %462 = vrot.lane.b32.xlu0 %v454_v34, %s1789_s29  ;;  %v694_v9 = vsel %vm2051_vm7, %v684_v3, 0  ;;  %v693_v10 = vsel %vm691_vm8, %v1984_v16, 0  ;;  %v696_v12 = vsel %vm2051_vm7, %v686_v11, 0  ;;  %v985_v13 = vsel %vm984_vm13, 65537, %v1788_v1  ;;  %v1570_v3 = vld [vmem:[%s2404_s1 + $0x2] sm:$0x3] }
  0xbf   : > { %v910_v4 = vsel %vm909_vm1, 65537, %v1788_v1  ;;  %vm351_vm3 = vcmask 1043456   ;;  %v1573_v46 = vcombine.low %v1984_v16, %v1788_v1  ;;  %v379_v50 = vrot.slane %v2089_v15, 4 }
  0xc0   : > { %v2091_v18 = vpop.permute.xlu0 %369  ;;  %v2093_v19 = vpop.permute.xlu1 %731  ;;  %vm742_vm4 = vcmask 916480   ;;  %vm1061_vm7 = vcmask 15360   ;;  %vm1036_vm10 = vcmask 1031168   ;;  %vm2411_vm11 = vcmask 801792  }
  0xc1   : > { %468 = vrot.lane.b32.xlu1 %v457_v39, %s1789_s29  ;;  %v377_v53 = vrot.slane %v2091_v18, 4  ;;  %vm939_vm14 = vcmask 277504  }
  0xc2   : > { %466 = vrot.lane.b32.xlu0 %v456_v41, %s1789_s29  ;;  %s1800_s29 = smov 34  }
  0xc4   : > { %v2095_v20 = vpop.permute.xlu0 %729  ;;  %v372_v21 = vpop.permute.xlu1 %371 }
  0xc5   : > { %417 = vrot.lane.b32.xlu1 %v408_v42, %s1794_s26 }
  0xc6   : > { %415 = vrot.lane.b32.xlu0 %v407_v44, %s1794_s26 }
  0xc8   : > { %v2097_v22 = vpop.permute.xlu1 %735  ;;  %v2099_v23 = vpop.permute.xlu0 %733 }
  0xc9   : > { %421 = vrot.lane.b32.xlu1 %v410_v49, %s1794_s26  ;;  %v380_v49 = vrot.slane %v376_v17, 4 }
  0xca   : > { %419 = vrot.lane.b32.xlu0 %v409_v51, %s1794_s26 }
  0xcb   : > { %v384_v62 = vsel %vm351_vm3, %v379_v50, %v380_v49 }
  0xcd   : > { %770 = vrot.lane.b32.xlu1 %v761_v52, %s1793_s25 }
  0xce   : > { %768 = vrot.lane.b32.xlu0 %v760_v54, %s1793_s25  ;;  %v378_v54 = vrot.slane %v372_v21, 4 }
  0xd1   : > { %774 = vrot.lane.b32.xlu1 %v763_v59, %s1793_s25 }
  0xd2   : > { %772 = vrot.lane.b32.xlu0 %v1788_v1, %s1793_s25  ;;  %s1804_s25 = smov 96  }
  0xd5   : > { %341 = vrot.lane.b32.xlu1 %v332_v61, %s1792_s16 }
  0xd6   : > { %339 = vrot.lane.b32.xlu0 %v331_v63, %s1792_s16  ;;  %v381_v63 = vsel %vm351_vm3, %v377_v53, %v378_v54 }
  0xd9   : > { %345 = vrot.lane.b32.xlu1 %v334_v7, %s1792_s16 }
  0xda   : > { %343 = vrot.lane.b32.xlu0 %v333_v8, %s1792_s16  ;;  %s1803_s16 = smov 32   ;;  %v738_v8 = vrot.slane %v2093_v19, 4 }
  0xdd   : > { %703 = vrot.lane.b32.xlu1 %v694_v9, %s1790_s12 }
  0xde   : > { %701 = vrot.lane.b32.xlu0 %v693_v10, %s1790_s12  ;;  %v737_v10 = vrot.slane %v2095_v20, 4 }
  0xe1   : > { %707 = vrot.lane.b32.xlu1 %v696_v12, %s1790_s12 }
  0xe2   : > { %705 = vrot.lane.b32.xlu0 %v1788_v1, %s1790_s12  ;;  %s1801_s12 = smov 94  }
  0xe5   : > { %1077 = vrot.lane.b32.xlu1 %v985_v13, %s1797_s10 }
  0xe6   : > { %875 = vperm.xlu0 %1689, %v872_v14   ;;  %v740_v14 = vrot.slane %v2097_v22, 4 }
  0xe9   : > { %1033 = vrot.lane.b32.xlu1 %v910_v4, %s1798_s11 }
  0xea   : > { %986 = vrot.lane.b32.xlu0 %v985_v13, %s1799_s23 }
  0xed   : > { %1338 = vrot.lane.b32.xlu1 %v985_v13, %s1800_s29 }
  0xee   : > { %911 = vrot.lane.b32.xlu0 %v910_v4, %s1801_s12 }
  0xf1   : > { %1271 = vrot.lane.b32.xlu1 %v910_v4, %s1802_s14  ;;  %v739_v4 = vrot.slane %v2099_v23, 4 }
  0xf2   : > { %959 = vrot.lane.b32.xlu0 %v2084_v5, %s1803_s16 }
  0xf6   : > { %1317 = vrot.lane.b32.xlu0 %v1788_v1, %s1804_s25 }
  0xfa   : > { %1095 = vrot.lane.b32.xlu0 %v1788_v1, %s1798_s11 }
 0x127   : > { %v509_v24 = vpop.permute.xlu1 %508 }
 0x128   : > { %v507_v25 = vpop.permute.xlu0 %506  ;;  %v515_v26 = vrot.slane %v509_v24, 4 }
 0x129   : > { %v514_v27 = vrot.slane %v507_v25, 4 }
 0x12b   : > { %v513_v28 = vpop.permute.xlu1 %512  ;;  %v518_v32 = vsel %vm351_vm3, %v514_v27, %v515_v26 }
 0x12c   : > { %v517_v29 = vrot.slane %v513_v28, 4  ;;  %v511_v30 = vpop.permute.xlu0 %510  ;;  %v519_v36 = vsel %vm450_vm9, %v507_v25, %v518_v32 }
 0x12d   : > { %v516_v31 = vrot.slane %v511_v30, 4 }
 0x12f   : > { %v465_v33 = vpop.permute.xlu1 %464  ;;  %v520_v34 = vsel %vm351_vm3, %v516_v31, %v517_v29  ;;  %v741_v29 = vsel %vm351_vm3, %v737_v10, %v738_v8  ;;  %v1074_v8 = vld [vmem:[#allocation3 + $0xc] sm:$0xf] }
 0x130   : > { %v463_v35 = vpop.permute.xlu0 %462  ;;  %v521_v37 = vsel %vm450_vm9, %v511_v30, %v520_v34  ;;  %v471_v39 = vrot.slane %v465_v33, 4  ;;  %vm382_vm9 = vcmask 130048   ;;  %v744_v30 = vsel %vm351_vm3, %v739_v4, %v740_v14  ;;  %v1585_v14 = vld [vmem:[%s2404_s1 + $0x4] sm:$0x3] }
 0x131   : > { %v470_v40 = vrot.slane %v463_v35, 4  ;;  %v1576_v41 = vcombine.high %v519_v36, %v521_v37  ;;  %v1575_v42 = vcombine.low %v519_v36, %v521_v37  ;;  %v385_v9 = vsel %vm382_vm9, %v2089_v15, %v384_v62 }
 0x132   : > { %v383_v13 = vsel %vm382_vm9, %v2091_v18, %v381_v63  ;;  %v743_v36 = vsel %vm742_vm4, %v2095_v20, %v741_v29  ;;  %v745_v37 = vsel %vm742_vm4, %v2099_v23, %v744_v30  ;;  %v1335_v29 = vld [vmem:[#allocation3 + $0xc] sm:$0xf]  ;;  %vm914_vm9 = vcmask 769024  }
 0x133   : > { %v469_v43 = vpop.permute.xlu1 %468  ;;  %578 = vmatprep.subr.bf16.mxu0 %v1576_v41  ;;  %v474_v47 = vsel %vm351_vm3, %v470_v40, %v471_v39  ;;  %v1581_v18 = vcombine.high %v383_v13, %v385_v9  ;;  %v1580_v33 = vcombine.low %v383_v13, %v385_v9  ;;  %v1588_v23 = vcombine.low %v743_v36, %v745_v37 }
 0x134   : > { %v473_v44 = vrot.slane %v469_v43, 4  ;;  %579 = vmatpush1.bf16.msra.mxu0 %v1575_v42  ;;  %v467_v45 = vpop.permute.xlu0 %466  ;;  %v476_v55 = vsel %vm475_vm6, %v463_v35, %v474_v47 }
 0x135   : > { %v472_v48 = vrot.slane %v467_v45, 4  ;;  %580 = vmatprep.subr.bf16.mxu0 %v1574_v38 }
 0x137   : > { %v477_v51 = vsel %vm351_vm3, %v472_v48, %v473_v44  ;;  %v418_v52 = vpop.permute.xlu1 %417 }
 0x138   : > { %v478_v56 = vsel %vm475_vm6, %v467_v45, %v477_v51  ;;  %581 = vmatpush1.bf16.msra.mxu0 %v1573_v46  ;;  %v416_v57 = vpop.permute.xlu0 %415  ;;  %v424_v59 = vrot.slane %v418_v52, 4  ;;  %vm564_vm6 = vcmask 392192   ;;  %v1589_v45 = vcombine.high %v743_v36, %v745_v37  ;;  %v1306_v36 = vld [vmem:[#allocation3 + $0xc] sm:$0xf] }
 0x139   : > { %v1571_v16 = vcombine.low %v476_v55, %v478_v56  ;;  %v1572_v58 = vcombine.high %v476_v55, %v478_v56  ;;  %v423_v60 = vrot.slane %v416_v57, 4 }
 0x13b   : > { %v422_v61 = vpop.permute.xlu1 %421  ;;  %582 = vmatprep.subr.bf16.mxu0 %v1572_v58  ;;  %v427_v7 = vsel %vm351_vm3, %v423_v60, %v424_v59 }
 0x13c   : > { %v426_v0 = vrot.slane %v422_v61, 4  ;;  %583 = vmatpush1.bf16.msra.mxu0 %v1571_v16  ;;  %v420_v2 = vpop.permute.xlu0 %419  ;;  %v429_v19 = vsel %vm428_vm5, %v416_v57, %v427_v7  ;;  %v436_v61 = vld [vmem:[%s2404_s1] sm:$0x3] }
 0x13d   : > { %v425_v6 = vrot.slane %v420_v2, 4 }
 0x13f   : > { %v771_v11 = vpop.permute.xlu1 %770  ;;  %v430_v12 = vsel %vm351_vm3, %v425_v6, %v426_v0  ;;  %1577 = vmatmul.mubr.msk.bf16.vlgmr.msra.gmra.mxu0 %vm564_vm6, %v1570_v3 }
 0x140   : > { %v769_v17 = vpop.permute.xlu0 %768  ;;  %v431_v21 = vsel %vm428_vm5, %v420_v2, %v430_v12  ;;  %861 = vmatprep.mubr.bf16.mxu0 %v1788_v1  ;;  %v777_v15 = vrot.slane %v771_v11, 4  ;;  %v1076_v11 = vld [vmem:[#allocation3 + $0x1c] sm:$0xf] }
 0x141   : > { %v776_v24 = vrot.slane %v769_v17, 4  ;;  %v1583_v25 = vcombine.high %v429_v19, %v431_v21  ;;  %v1582_v26 = vcombine.low %v429_v19, %v431_v21  ;;  %v1032_v19 = vld [vmem:[#allocation3 + $0x18] sm:$0xf] }
 0x143   : > { %v775_v27 = vpop.permute.xlu1 %774  ;;  %652 = vmatprep.subr.bf16.mxu1 %v1583_v25  ;;  %v780_v31 = vsel %vm351_vm3, %v776_v24, %v777_v15 }
 0x144   : > { %v779_v28 = vrot.slane %v775_v27, 4  ;;  %653 = vmatpush1.bf16.msra.mxu1 %v1582_v26  ;;  %v773_v22 = vpop.permute.xlu0 %772  ;;  %v781_v38 = vsel %vm327_vm2, %v769_v17, %v780_v31 }
 0x145   : > { %v778_v32 = vrot.slane %v773_v22, 4  ;;  %654 = vmatprep.subr.bf16.mxu1 %v1581_v18 }
 0x147   : > { %v782_v34 = vsel %vm351_vm3, %v778_v32, %v779_v28  ;;  %v342_v35 = vpop.permute.xlu1 %341  ;;  %v979_v28 = vld [vmem:[#allocation3 + $0x18] sm:$0xf]  ;;  %v1337_v32 = vld [vmem:[#allocation3 + $0x1c] sm:$0xf] }
 0x148   : > { %v783_v39 = vsel %vm327_vm2, %v773_v22, %v782_v34  ;;  %655 = vmatpush1.bf16.msra.mxu1 %v1580_v33  ;;  %v340_v40 = vpop.permute.xlu0 %339  ;;  %v348_v43 = vrot.slane %v342_v35, 4  ;;  %v950_v35 = vld [vmem:[#allocation3 + $0x18] sm:$0xf] }
 0x149   : > { %v1590_v41 = vcombine.low %v781_v38, %v783_v39  ;;  %v1591_v42 = vcombine.high %v781_v38, %v783_v39  ;;  %v347_v44 = vrot.slane %v340_v40, 4  ;;  %v1308_v38 = vld [vmem:[#allocation3 + $0x1c] sm:$0xf] }
 0x14b   : > { %839 = vmatprep.subr.bf16.mxu0 %v1591_v42  ;;  %v346_v46 = vpop.permute.xlu1 %345  ;;  %v352_v20 = vsel %vm351_vm3, %v347_v44, %v348_v43 }
 0x14c   : > { %v350_v47 = vrot.slane %v346_v46, 4  ;;  %840 = vmatpush1.bf16.msra.mxu0 %v1590_v41  ;;  %v344_v48 = vpop.permute.xlu0 %343  ;;  %v354_v52 = vsel %vm353_vm15, %v340_v40, %v352_v20  ;;  %v904_v46 = vld [vmem:[#allocation3 + $0x18] sm:$0xf] }
 0x14d   : > { %v349_v49 = vrot.slane %v344_v48, 4  ;;  %841 = vmatprep.subr.bf16.mxu0 %v1589_v45 }
 0x14f   : > { %v355_v50 = vsel %vm351_vm3, %v349_v49, %v350_v47  ;;  %v704_v51 = vpop.permute.xlu1 %703 }
 0x150   : > { %v356_v53 = vsel %vm353_vm15, %v344_v48, %v355_v50  ;;  %842 = vmatpush1.bf16.msra.mxu0 %v1588_v23  ;;  %v702_v54 = vpop.permute.xlu0 %701  ;;  %v710_v57 = vrot.slane %v704_v51, 4 }
 0x151   : > { %v1578_v55 = vcombine.low %v354_v52, %v356_v53  ;;  %v1579_v56 = vcombine.high %v354_v52, %v356_v53  ;;  %v709_v16 = vrot.slane %v702_v54, 4 }
 0x153   : > { %v708_v58 = vpop.permute.xlu1 %707  ;;  %656 = vmatprep.subr.bf16.mxu1 %v1579_v56  ;;  %v713_v62 = vsel %vm351_vm3, %v709_v16, %v710_v57 }
 0x154   : > { %v712_v59 = vrot.slane %v708_v58, 4  ;;  %657 = vmatpush1.bf16.msra.mxu1 %v1578_v55  ;;  %v706_v60 = vpop.permute.xlu0 %705  ;;  %v714_v3 = vsel %vm403_vm12, %v702_v54, %v713_v62 }
 0x155   : > { %v711_v63 = vrot.slane %v706_v60, 4 }
 0x157   : > { %v715_v0 = vsel %vm351_vm3, %v711_v63, %v712_v59  ;;  %1584 = vmatmul.mubr.msk.bf16.vlgmr.msra.gmra.mxu1 %vm564_vm6, %v436_v61  ;;  %v1078_v2 = vpop.permute.xlu1 %1077 }
 0x158   : > { %v716_v6 = vsel %vm403_vm12, %v706_v60, %v715_v0  ;;  %v1079_v7 = vrot.slane %v1078_v2, 4  ;;  %1184 = vmatprep.mubr.bf16.mxu1 %v1788_v1 }
 0x159   : > { %v1586_v9 = vcombine.low %v714_v3, %v716_v6  ;;  %v1587_v10 = vcombine.high %v714_v3, %v716_v6 }
 0x15a   : > { %vm1082_vm15 = vcmp.ne.s16.totalorder %v1079_v7, 0  ;;  %v2181_v34 = vsel %vm1061_vm7, %v1079_v7, %v1078_v2 }
 0x15b   : > { %843 = vmatprep.subr.bf16.mxu0 %v1587_v10  ;;  %v1084_v12 = vsel %vm1082_vm15, %v1074_v8, 0  ;;  %v1034_v13 = vpop.permute.xlu1 %1033  ;;  %v1086_v17 = vsel %vm1082_vm15, %v1076_v11, 0  ;;  %vm1081_vm8 = vcmp.ne.s16.totalorder %v2181_v34, 0 }
 0x15c   : > { %844 = vmatpush1.bf16.msra.mxu0 %v1586_v9  ;;  %1093 = vrot.lane.b32.xlu1 %v1084_v12, %s1798_s11  ;;  %v1035_v4 = vrot.slane %v1034_v13, 4 }
 0x15e   : > { %vm2159_vm12 = vcmp.ne.s16.totalorder %v1035_v4, 0  ;;  %v2191_v37 = vsel %vm1036_vm10, %v1035_v4, %v1034_v13 }
 0x15f   : > { %1592 = vmatmul.mubr.msk.bf16.vlgmr.msra.gmra.mxu0 %vm564_vm6, %v1585_v14  ;;  %v1043_v24 = vsel %vm2159_vm12, %v1032_v19, 0  ;;  %v1339_v25 = vpop.permute.xlu1 %1338  ;;  %vm1038_vm13 = vcmp.ne.s16.totalorder %v2191_v37, 0 }
 0x160   : > { %1097 = vrot.lane.b32.xlu1 %v1086_v17, %s1798_s11  ;;  %1258 = vmatprep.mubr.bf16.mxu0 %v1788_v1  ;;  %v1340_v26 = vrot.slane %v1339_v25, 4  ;;  %v1042_v40 = vsel %vm1038_vm13, %v2084_v5, 0  ;;  %v1268_v17 = vld [vmem:[#allocation3 + $0xc] sm:$0xf] }
 0x161   : > { %v2166_v15 = vpop.permute.xlu0 %875  ;;  %1052 = vrot.lane.b32.xlu0 %v1042_v40, %s1797_s10 }
 0x162   : > { %vm1343_vm5 = vcmp.ne.s16.totalorder %v1340_v26, 0  ;;  %v2204_v41 = vsel %vm939_vm14, %v1340_v26, %v1339_v25 }
 0x163   : > { %v1345_v31 = vsel %vm1343_vm5, %v1335_v29, 0  ;;  %v1347_v33 = vsel %vm1343_vm5, %v1337_v32, 0  ;;  %vm1342_vm1 = vcmp.ne.s16.totalorder %v2204_v41, 0  ;;  %v1272_v11 = vpop.permute.xlu1 %1271 }
 0x164   : > { %1054 = vrot.lane.b32.xlu1 %v1043_v24, %s1797_s10  ;;  %v1273_v14 = vrot.slane %v1272_v11, 4 }
 0x165   : > { %v987_v27 = vpop.permute.xlu0 %986 }
 0x166   : > { %v988_v18 = vrot.slane %v987_v27, 4 }
 0x168   : > { %vm2171_vm2 = vcmp.ne.s16.totalorder %v988_v18, 0  ;;  %v2195_v39 = vsel %vm2411_vm11, %v988_v18, %v987_v27  ;;  %v1270_v27 = vld [vmem:[#allocation3 + $0x1c] sm:$0xf] }
 0x169   : > { %v996_v30 = vsel %vm2171_vm2, %v979_v28, 0  ;;  %vm991_vm0 = vcmp.ne.s16.totalorder %v2195_v39, 0  ;;  %v912_v43 = vpop.permute.xlu0 %911 }
 0x16a   : > { %1007 = vrot.lane.b32.xlu1 %v996_v30, %s1802_s14  ;;  %v995_v42 = vsel %vm991_vm0, %v2084_v5, 0  ;;  %v913_v44 = vrot.slane %v912_v43, 4 }
 0x16b   : > { %1005 = vrot.lane.b32.xlu0 %v995_v42, %s1802_s14 }
 0x16c   : > { %v2214_v45 = vsel %vm914_vm9, %v913_v44, %v912_v43  ;;  %vm2217_vm15 = vcmp.ne.s16.totalorder %v913_v44, 0 }
 0x16d   : > { %vm916_vm4 = vcmp.ne.s16.totalorder %v2214_v45, 0  ;;  %v921_v48 = vsel %vm2217_vm15, %v904_v46, 0 }
 0x16e   : > { %1354 = vrot.lane.b32.xlu1 %v1345_v31, %s1801_s12  ;;  %v920_v20 = vsel %vm916_vm4, %v2084_v5, 0 }
 0x16f   : > { %1356 = vrot.lane.b32.xlu0 %v1788_v1, %s1801_s12 }
 0x172   : > { %1358 = vrot.lane.b32.xlu1 %v1347_v33, %s1801_s12  ;;  %v1456_v33 = vld [vmem:[%s2407_s4] sm:$0xf] }
 0x173   : > { %930 = vrot.lane.b32.xlu0 %v920_v20, %s1800_s29 }
 0x176   : > { %961 = vrot.lane.b32.xlu1 %v950_v35, %s1803_s16 }
 0x17a   : > { %1315 = vrot.lane.b32.xlu1 %v1306_v36, %s1804_s25 }
 0x17e   : > { %1319 = vrot.lane.b32.xlu1 %v1308_v38, %s1804_s25  ;;  %v2280_v38 = vpop.permute.xlu0 %959 }
 0x182   : > { %932 = vrot.lane.b32.xlu1 %v921_v48, %s1800_s29  ;;  %v2284_v40 = vpop.permute.xlu0 %1317 }
 0x186   : > { %v1096_v42 = vpop.permute.xlu0 %1095 }
 0x1ce   : > { %v1094_v34 = vpop.permute.xlu1 %1093 }
 0x1d2   : > { %v1098_v35 = vpop.permute.xlu1 %1097 }
 0x1d3   : > { %v1053_v44 = vpop.permute.xlu0 %1052 }
 0x1d6   : > { %v1055_v36 = vpop.permute.xlu1 %1054 }
 0x1dc   : > { %v1008_v37 = vpop.permute.xlu1 %1007 }
 0x1dd   : > { %v1006_v46 = vpop.permute.xlu0 %1005 }
 0x1e0   : > { %v2282_v39 = vpop.permute.xlu1 %1354 }
 0x1e1   : > { %v2292_v48 = vpop.permute.xlu0 %1356 }
 0x1e4   : > { %v2286_v41 = vpop.permute.xlu1 %1358 }
 0x1e8   : > { %v962_v43 = vpop.permute.xlu1 %961 }
 0x1ec   : > { %v2288_v45 = vpop.permute.xlu1 %1315 }
 0x1f0   : > { %v2290_v47 = vpop.permute.xlu1 %1319 }
 0x1f4   : > { %v2294_v20 = vpop.permute.xlu1 %932 }
 0x1ff   : > { %v602_v49 = vpop.f32.mrf.mxu0 }
 0x201   : > { %v604_v23 = vpop.f32.mrf.mxu0 }
 0x203   : > { %v606_v50 = vpop.f32.mrf.mxu0 }
 0x205   : > { %v607_v51 = vpop.f32.mrf.mxu0 }
 0x206   : > { %v1102_v51 = vrot.slane %v1098_v35, 4 }
 0x217   : > { %v676_v52 = vpop.f32.mrf.mxu1 }
 0x218   : > { %v677_v56 = vadd.f32 %v676_v52, %v602_v49  ;;  %v2296_v49 = vpop.permute.xlu0 %930  ;;  %v1101_v52 = vrot.slane %v1096_v42, 4 }
 0x219   : > { %v678_v53 = vpop.f32.mrf.mxu1 }
 0x21a   : > { %v679_v16 = vadd.f32 %v678_v53, %v604_v23 }
 0x21b   : > { %v680_v54 = vpop.f32.mrf.mxu1 }
 0x21d   : > { %v681_v55 = vpop.f32.mrf.mxu1 }
 0x21e   : > { %v1105_v55 = vsel %vm351_vm3, %v1101_v52, %v1102_v51 }
 0x21f   : > { %v863_v57 = vpop.f32.mrf.mxu0 }
 0x220   : > { %v870_v58 = vadd.f32 %v863_v57, %v677_v56  ;;  %v1100_v57 = vrot.slane %v1094_v34, 4  ;;  %v1692_v34 = vld [vmem:[#allocation2 + $0x14] sm:$0xff] }
 0x221   : > { %v865_v59 = vpop.f32.mrf.mxu0 }
 0x222   : > { %v878_v60 = vadd.f32 %v2166_v15, %v870_v58  ;;  %v871_v5 = vadd.f32 %v865_v59, %v679_v16  ;;  %v1059_v58 = vrot.slane %v1055_v36, 4  ;;  %v1012_v59 = vrot.slane %v1008_v37, 4 }
 0x223   : > { %v867_v61 = vpop.f32.mrf.mxu0 }
 0x224   : > { %v882_v62 = vmul.f32 0.1, %v878_v60  ;;  %v879_v63 = vadd.f32 %v2166_v15, %v871_v5  ;;  %vm880_vm5 = vcmp.ge.f32.partialorder %v878_v60, 0.0  ;;  %v966_v61 = vrot.slane %v962_v43, 4 }
 0x225   : > { %v868_v0 = vpop.f32.mrf.mxu0  ;;  %v936_v43 = vrot.slane %v2296_v49, 4 }
 0x226   : > { %vm881_vm11 = vcmp.ge.f32.partialorder %v879_v63, 0.0  ;;  %v883_v2 = vmul.f32 0.1, %v879_v63  ;;  %v884_v3 = vsel %vm880_vm5, %v878_v60, %v882_v62  ;;  %v965_v60 = vrot.slane %v2280_v38, 4 }
 0x227   : > { %v1106_v62 = vsel %vm1036_vm10, %v1096_v42, %v1105_v55  ;;  %v937_v42 = vrot.slane %v2294_v20, 4 }
 0x228   : > { %v885_v6 = vsel %vm881_vm11, %v879_v63, %v883_v2  ;;  %vm2239_vm11 = vcmp.ne.s16.totalorder %v1273_v14, 0  ;;  %v1058_v63 = vrot.slane %v1053_v44, 4  ;;  %v1011_v2 = vrot.slane %v1006_v46, 4 }
 0x229   : > { %v1624_v7 = vpack.c.bf16 %v885_v6, %v884_v3  ;;  %v1278_v24 = vsel %vm2239_vm11, %v1268_v17, 0  ;;  %v1280_v22 = vsel %vm2239_vm11, %v1270_v27, 0  ;;  %v1323_v17 = vrot.slane %v2284_v40, 4 }
 0x22a   : > { %v1063_v19 = vsel %vm351_vm3, %v1058_v63, %v1059_v58  ;;  %v1016_v27 = vsel %vm351_vm3, %v1011_v2, %v1012_v59 }
 0x22b   : > { %900 = vst [vmem:[#allocation3 + $0x4] sm:$0x33] %v1624_v7 }
 0x232   : > { %v948_v8 = vld [vmem:[#allocation3 + $0x8] sm:$0xf]  ;;  %v947_v9 = vld [vmem:[#allocation3] sm:$0xff] }
 0x233   : > { %957 = vrot.lane.b32.xlu1 %v948_v8, %s1803_s16  ;;  %955 = vrot.lane.b32.xlu0 %v947_v9, %s1803_s16  ;;  %v1030_v10 = vld [vmem:[#allocation3 + $0x8] sm:$0xf]  ;;  %v1040_v25 = vsel %vm1038_vm13, %v947_v9, 0  ;;  %v993_v28 = vsel %vm991_vm0, %v947_v9, 0  ;;  %v918_v31 = vsel %vm916_vm4, %v947_v9, 0 }
 0x234   : > { %v1041_v12 = vsel %vm2159_vm12, %v1030_v10, 0  ;;  %v2234_v13 = vld [vmem:[#allocation3 + $0x4] sm:$0xff]  ;;  %vm1014_vm12 = vcmask 244736  }
 0x235   : > { %v977_v4 = vld [vmem:[#allocation3 + $0x8] sm:$0xf]  ;;  %v1083_v21 = vsel %vm1081_vm8, %v2234_v13, 0  ;;  %v1344_v29 = vsel %vm1342_vm1, %v2234_v13, 0  ;;  %v1274_v30 = vsel %vm1014_vm12, %v1273_v14, %v1272_v11  ;;  %v1361_v14 = vrot.slane %v2282_v39, 4 }
 0x236   : > { %v994_v15 = vsel %vm2171_vm2, %v977_v4, 0  ;;  %v902_v26 = vld [vmem:[#allocation3 + $0x8] sm:$0xf]  ;;  %vm1275_vm2 = vcmp.ne.s16.totalorder %v1274_v30, 0  ;;  %v1363_v4 = vrot.slane %v2286_v41, 4  ;;  %vm968_vm8 = vcmask 261120  }
 0x237   : > { %1050 = vrot.lane.b32.xlu1 %v1041_v12, %s1797_s10  ;;  %1313 = vrot.lane.b32.xlu0 %v2234_v13, %s1804_s25  ;;  %v919_v18 = vsel %vm2217_vm15, %v902_v26, 0  ;;  %v1277_v32 = vsel %vm1275_vm2, %v2234_v13, 0  ;;  %v1322_v26 = vrot.slane %v2288_v45, 4  ;;  %v1597_v35 = vcombine.low %v2234_v13, %v1692_v34  ;;  %s1488_s25 = scalar_lea.hbm %s2408_s5, %s1625_s28 }
 0x238   : > { %v1017_v36 = vsel %vm1014_vm12, %v1006_v46, %v1016_v27  ;;  %v1609_v27 = vld [vmem:[%s2406_s3 + $0x4] sm:$0x3] }
 0x23b   : > { %1003 = vrot.lane.b32.xlu1 %v994_v15, %s1802_s14  ;;  %1091 = vrot.lane.b32.xlu0 %v1083_v21, %s1798_s11  ;;  %v1362_v15 = vrot.slane %v2292_v48, 4  ;;  %s1721_s11 = scalar_lea.vmem %s1491_s7, 128 }
 0x23c   : > { %p1722_p11 = scmp.ne.s32.totalorder %s1491_s7, %s1721_s11 }
 0x23d   : > { %v1366_v37 = vsel %vm351_vm3, %v1362_v15, %v1363_v4 }
 0x23e   : > { %p1723_p13 = pnand %p1722_p11, %p2440_p12 }
 0x23f   : > { %1287 = vrot.lane.b32.xlu1 %v1278_v24, %s1799_s23  ;;  %1048 = vrot.lane.b32.xlu0 %v1040_v25, %s1797_s10  ;;  %v1598_v24 = vcombine.high %v2234_v13, %v1788_v1  ;;  %v970_v25 = vsel %vm351_vm3, %v965_v60, %v966_v61  ;;  %v1594_v60 = vld [vmem:[%s2406_s3 + $0x2] sm:$0x3]  ;;  %s1476_s10 = scalar_lea.sflag [#allocation7], %s1934_s13 }
 0x240   : > { %p1724_p1 = pneg %p1723_p13 }
 0x243   : > { %928 = vrot.lane.b32.xlu1 %v919_v18, %s1800_s29  ;;  %1001 = vrot.lane.b32.xlu0 %v993_v28, %s1802_s14 }
 0x247   : > { %1352 = vrot.lane.b32.xlu0 %v1344_v29, %s1801_s12  ;;  %1291 = vrot.lane.b32.xlu1 %v1280_v22, %s1799_s23 }
 0x24b   : > { %926 = vrot.lane.b32.xlu0 %v918_v31, %s1800_s29 }
 0x24f   : > { %1285 = vrot.lane.b32.xlu0 %v1277_v32, %s1799_s23 }
 0x253   : > { %1289 = vrot.lane.b32.xlu0 %v1788_v1, %s1799_s23  ;;  %v1324_v1 = vrot.slane %v2290_v47, 4  ;;  %s1805_s23 = smov [#allocation8]  }
 0x254   : > { %s1725_s22 = sshll.u32 %s1805_s23, 4  ;;  %s1726_s22 = int_to_ptr.vmem [resolvable:$false] %s1725_s22 }
 0x255   : > { %v1328_v52 = vsel %vm351_vm3, %v1323_v17, %v1324_v1  ;;  %s1727_s17 = scalar_lea.vmem %s1726_s22, 256  ;;  %p1728_p3 = scmp.lt.s32.totalorder %s1491_s7, %s1726_s22 }
 0x256   : > { %p1729_p5 = scmp.lt.s32.totalorder %s1727_s17, %s1721_s11 }
 0x257   : > { %1459 = vperm.xlu0 %1689, %v1456_v33   ;;  %v1064_v33 = vsel %vm1061_vm7, %v1053_v44, %v1063_v19 }
 0x258   : > { %p1730_p8 = por %p1729_p5, %p1728_p3 }
 0x25a   : > { %p1731_p10 = pnand %p1730_p8, %p1724_p1 }
 0x2a5   : > { %v958_v23 = vpop.permute.xlu1 %957  ;;  %v956_v50 = vpop.permute.xlu0 %955 }
 0x2a6   : > { %v964_v3 = vrot.slane %v958_v23, 4  ;;  %v963_v6 = vrot.slane %v956_v50, 4 }
 0x2a8   : > { %v967_v29 = vsel %vm351_vm3, %v963_v6, %v964_v3 }
 0x2a9   : > { %v1051_v53 = vpop.permute.xlu1 %1050  ;;  %v2298_v54 = vpop.permute.xlu0 %1313  ;;  %v969_v45 = vsel %vm968_vm8, %v956_v50, %v967_v29  ;;  %v1367_v50 = vsel %vm914_vm9, %v2292_v48, %v1366_v37 }
 0x2aa   : > { %v1057_v9 = vrot.slane %v1051_v53, 4  ;;  %v1321_v30 = vrot.slane %v2298_v54, 4  ;;  %v971_v53 = vsel %vm968_vm8, %v2280_v38, %v970_v25 }
 0x2ab   : > { %v1604_v63 = vcombine.low %v969_v45, %v971_v53 }
 0x2ac   : > { %v1325_v23 = vsel %vm351_vm3, %v1321_v30, %v1322_v26 }
 0x2ad   : > { %v1092_v56 = vpop.permute.xlu0 %1091  ;;  %v1004_v5 = vpop.permute.xlu1 %1003 }
 0x2ae   : > { %v1099_v16 = vrot.slane %v1092_v56, 4  ;;  %v1010_v31 = vrot.slane %v1004_v5, 4 }
 0x2b0   : > { %v1103_v0 = vsel %vm351_vm3, %v1099_v16, %v1100_v57  ;;  %v941_v16 = vsel %vm351_vm3, %v936_v43, %v937_v42 }
 0x2b1   : > { %v1104_v7 = vsel %vm1036_vm10, %v1092_v56, %v1103_v0  ;;  %v1049_v8 = vpop.permute.xlu0 %1048  ;;  %v2316_v18 = vpop.permute.xlu1 %1287  ;;  %v1605_v56 = vcombine.high %v969_v45, %v971_v53  ;;  %v942_v3 = vsel %vm939_vm14, %v2296_v49, %v941_v16  ;;  %v1022_v49 = vld [vmem:[%s2406_s3] sm:$0x3]  ;;  %vm2438_vm10 = vcmask 801792  }
 0x2b2   : > { %v1599_v10 = vcombine.low %v1104_v7, %v1106_v62  ;;  %v1600_v11 = vcombine.high %v1104_v7, %v1106_v62  ;;  %v1056_v12 = vrot.slane %v1049_v8, 4  ;;  %vm2439_vm13 = vmmov %vm2438_vm10 }
 0x2b4   : > { %v1060_v21 = vsel %vm351_vm3, %v1056_v12, %v1057_v9  ;;  %1162 = vmatprep.subr.bf16.mxu1 %v1600_v11  ;;  %v1294_v12 = vrot.slane %v2316_v18, 4 }
 0x2b5   : > { %v1062_v28 = vsel %vm1061_vm7, %v1049_v8, %v1060_v21  ;;  %1163 = vmatpush1.bf16.msra.mxu1 %v1599_v10  ;;  %v1002_v22 = vpop.permute.xlu0 %1001  ;;  %v929_v55 = vpop.permute.xlu1 %928  ;;  %vm1326_vm7 = vcmask 785408  }
 0x2b6   : > { %v1009_v32 = vrot.slane %v1002_v22, 4  ;;  %1164 = vmatprep.subr.bf16.mxu1 %v1598_v24  ;;  %v1596_v39 = vcombine.high %v1062_v28, %v1064_v33  ;;  %v1595_v20 = vcombine.low %v1062_v28, %v1064_v33  ;;  %v1327_v58 = vsel %vm1326_vm7, %v2298_v54, %v1325_v23 }
 0x2b7   : > { %v935_v48 = vrot.slane %v929_v55, 4  ;;  %v1329_v0 = vsel %vm1326_vm7, %v2284_v40, %v1328_v52 }
 0x2b8   : > { %v1013_v41 = vsel %vm351_vm3, %v1009_v32, %v1010_v31  ;;  %v1613_v2 = vcombine.high %v1327_v58, %v1329_v0  ;;  %v1612_v40 = vcombine.low %v1327_v58, %v1329_v0 }
 0x2b9   : > { %v1015_v47 = vsel %vm1014_vm12, %v1002_v22, %v1013_v41  ;;  %1165 = vmatpush1.bf16.msra.mxu1 %v1597_v35  ;;  %v1353_v44 = vpop.permute.xlu0 %1352  ;;  %v1292_v11 = vpop.permute.xlu1 %1291  ;;  %v1464_v35 = vld [vmem:[%s1940_s15] sm:$0xff] }
 0x2ba   : > { %v1606_v13 = vcombine.low %v1015_v47, %v1017_v36  ;;  %v1607_v51 = vcombine.high %v1015_v47, %v1017_v36  ;;  %v1360_v46 = vrot.slane %v1353_v44, 4  ;;  %1166 = vmatprep.subr.bf16.mxu1 %v1596_v39  ;;  %v1296_v4 = vrot.slane %v1292_v11, 4 }
 0x2bb   : > { %v1466_v45 = vcombine.high %v1464_v35, %v1464_v35 }
 0x2bc   : > { %v1364_v57 = vsel %vm351_vm3, %v1360_v46, %v1361_v14  ;;  %1236 = vmatprep.subr.bf16.mxu0 %v1607_v51 }
 0x2bd   : > { %v1365_v59 = vsel %vm914_vm9, %v1353_v44, %v1364_v57  ;;  %1167 = vmatpush1.bf16.msra.mxu1 %v1595_v20  ;;  %1237 = vmatpush1.bf16.msra.mxu0 %v1606_v13  ;;  %v927_v38 = vpop.permute.xlu0 %926 }
 0x2be   : > { %v1614_v5 = vcombine.low %v1365_v59, %v1367_v50  ;;  %v1615_v61 = vcombine.high %v1365_v59, %v1367_v50  ;;  %v934_v62 = vrot.slane %v927_v38, 4  ;;  %1238 = vmatprep.subr.bf16.mxu0 %v1605_v56 }
 0x2c0   : > { %v938_v54 = vsel %vm351_vm3, %v934_v62, %v935_v48  ;;  %1601 = vmatmul.mubr.msk.bf16.vlgmr.msra.gmra.mxu1 %vm564_vm6, %v1594_v60  ;;  %1423 = vmatprep.subr.bf16.mxu1 %v1615_v61 }
 0x2c1   : > { %v940_v6 = vsel %vm939_vm14, %v927_v38, %v938_v54  ;;  %1239 = vmatpush1.bf16.msra.mxu0 %v1604_v63  ;;  %1424 = vmatpush1.bf16.msra.mxu1 %v1614_v5  ;;  %v1286_v7 = vpop.permute.xlu0 %1285 }
 0x2c2   : > { %v1602_v8 = vcombine.low %v940_v6, %v942_v3  ;;  %v1603_v9 = vcombine.high %v940_v6, %v942_v3  ;;  %v1293_v10 = vrot.slane %v1286_v7, 4  ;;  %1425 = vmatprep.subr.bf16.mxu1 %v1613_v2  ;;  %1445 = vmatprep.mubr.bf16.mxu1 %v1692_v34 }
 0x2c4   : > { %1240 = vmatprep.subr.bf16.mxu0 %v1603_v9  ;;  %v1297_v17 = vsel %vm351_vm3, %v1293_v10, %v1294_v12 }
 0x2c5   : > { %1241 = vmatpush1.bf16.msra.mxu0 %v1602_v8  ;;  %1426 = vmatpush1.bf16.msra.mxu1 %v1612_v40  ;;  %v1290_v14 = vpop.permute.xlu0 %1289  ;;  %v1298_v21 = vsel %vm2438_vm10, %v1286_v7, %v1297_v17 }
 0x2c6   : > { %v1295_v19 = vrot.slane %v1290_v14, 4 }
 0x2c8   : > { %v1299_v15 = vsel %vm351_vm3, %v1295_v19, %v1296_v4  ;;  %1608 = vmatmul.mubr.msk.bf16.vlgmr.msra.gmra.mxu0 %vm564_vm6, %v1022_v49 }
 0x2c9   : > { %v1300_v24 = vsel %vm2439_vm13, %v1290_v14, %v1299_v15 }
 0x2ca   : > { %v1610_v25 = vcombine.low %v1298_v21, %v1300_v24  ;;  %v1611_v26 = vcombine.high %v1298_v21, %v1300_v24 }
 0x2cc   : > { %1427 = vmatprep.subr.bf16.mxu1 %v1611_v26 }
 0x2cd   : > { %1428 = vmatpush1.bf16.msra.mxu1 %v1610_v25 }
 0x2d0   : > { %1616 = vmatmul.mubr.msk.bf16.vlgmr.msra.gmra.mxu1 %vm564_vm6, %v1609_v27 }
 0x2d2   : > { %v1460_v39 = vpop.permute.xlu0 %1459 }
 0x380   : > { %v1186_v18 = vpop.f32.mrf.mxu1 }
 0x382   : > { %v1188_v28 = vpop.f32.mrf.mxu1 }
 0x384   : > { %v1190_v22 = vpop.f32.mrf.mxu1 }
 0x386   : > { %v1191_v29 = vpop.f32.mrf.mxu1 }
 0x388   : > { %v1260_v30 = vpop.f32.mrf.mxu0 }
 0x389   : > { %v1261_v33 = vadd.f32 %v1260_v30, %v1186_v18 }
 0x38a   : > { %v1262_v31 = vpop.f32.mrf.mxu0 }
 0x38b   : > { %v1263_v36 = vadd.f32 %v1262_v31, %v1188_v28 }
 0x38c   : > { %v1264_v32 = vpop.f32.mrf.mxu0 }
 0x38e   : > { %v1265_v1 = vpop.f32.mrf.mxu0 }
 0x390   : > { %v1447_v34 = vpop.f32.mrf.mxu1 }
 0x391   : > { %v1454_v37 = vadd.f32 %v1447_v34, %v1261_v33 }
 0x392   : > { %v1449_v41 = vpop.f32.mrf.mxu1 }
 0x393   : > { %v1462_v42 = vadd.f32 %v1460_v39, %v1454_v37  ;;  %v1455_v43 = vadd.f32 %v1449_v41, %v1263_v36 }
 0x394   : > { %v1451_v47 = vpop.f32.mrf.mxu1 }
 0x395   : > { %v1463_v44 = vadd.f32 %v1460_v39, %v1455_v43  ;;  %v1468_v13 = vadd.f32 %v1464_v35, %v1462_v42 }
 0x396   : > { %v1452_v23 = vpop.f32.mrf.mxu1 }
 0x397   : > { %v1469_v51 = vadd.f32 %v1466_v45, %v1463_v44 }
 0x399   : > { %v1472_v46 = vcombine.low %v1468_v13, %v1469_v51 }
 0x39b   : > { %1474 = vst [vmem:[%s240_s8] sm:$0xff] %v1472_v46 }
 0x39c   : > { %1734 = shalt.err (!%p1731_p10)
}
 0x39d   : > { %s1735_s29 = scalar_lea.hbm %s1488_s25, 128  ;;  %s1739_s14 = scalar_lea.hbm %s2408_s5, 256 }
 0x39e   : > { %p1736_p2 = scmp.ne.s32.totalorder %s1488_s25, %s1735_s29  ;;  %p1740_p7 = scmp.lt.s32.totalorder %s1488_s25, %s2408_s5 }
 0x39f   : > { %p1741_p0 = scmp.lt.s32.totalorder %s1739_s14, %s1735_s29 }
 0x3a0   : > { %p1737_p4 = pnand %p1736_p2, %p2440_p12 }
 0x3a1   : > { %p1742_p6 = por %p1741_p0, %p1740_p7 }
 0x3a2   : > { %p1738_p9 = pneg %p1737_p4 }
 0x3a4   : > { %p1743_p11 = pnand %p1742_p6, %p1738_p9 }
 0x3a6   : > { %1746 = shalt.err (!%p1743_p11)
}
 0x3a7   : > { %1628 = dma.vmem_to_hbm [thread:$0]  (%p2440_p12), %s1491_s7, 128, %s1488_s25, %s1476_s10  }
 0x3a8 PF: > { %s1502_s28 = sand.u32 1, %s1773_s18   ;;  %p2441_p13 = scmp.ne.s32.totalorder %s2415_s6, 0 }
 0x3a9   : > { %p2442_p1 = scmp.ge.s32.totalorder %s1785_s21, 2  ;;  %s1503_s8 = scalar_lea.sflag [#allocation7], %s1502_s28 }
 0x3ab   : > { %p1635_p3 = pnand %p2442_p1, %p2441_p13 }
 0x3ad   : > { %p1636_p5 = pneg %p1635_p3 }
 0x3af   : > { %1768 = dma.done.wait (%p1636_p5), %s1503_s8, 128  }
 0x3b0   : > { %1770 = vsyncadd (%p1636_p5), %s1503_s8, 4294967168  ;;  %p18_p8 = scmp.ge.s32.totalorder %s1861_s24, 4   ;;  %s2443_s18 = smov %s1777_s19 }
 0x3b1   : > { %s2444_s19 = smov %s1781_s20  ;;  %s2445_s20 = smov %s1873_s27 }
 0x3b2   : > { %s2446_s21 = smov %s1861_s24  ;;  %20 = sbr.rel (!%p18_p8) target bundleno = 5 (0x5), region = 90 }
 0x3b7   :  { %1508 = vsyncpa [#allocation6], 1 }
 0x3b8   :  { %1510 = vsyncpa [#allocation6 + $0x1], 1 }
 0x3b9   :  { %1511 = vsyncpa [#allocation7], 1 }
 0x3ba   :  { %1513 = vsyncpa [#allocation7 + $0x1], 1 }

</bundles_post_ra>
